<compile_context>
chip_gen: v7x
topology: tpu7x:2x2x1
jax: 0.10.0
libtpu: 0.0.40
codegen_flags: <defaults>
</compile_context>

<pallas_src>
import functools

import jax
import jax.numpy as jnp
from jax.experimental import pallas as pl
from jax.experimental.pallas import tpu as pltpu


def _round_up(x, m):
    return (x + m - 1) // m * m


def _pad_to(x, shape):
    pads = [(0, s - d) for d, s in zip(x.shape, shape)]
    if any(p for _, p in pads):
        x = jnp.pad(x, pads)
    return x


def _vmem_capacity_bytes():
    try:
        cap = getattr(pltpu.get_tpu_info(), "vmem_capacity_bytes", None)
        if cap:
            return int(cap)
    except Exception:
        pass
    return 64 * 1024 * 1024  # conservative: v7x per-TensorCore VMEM


def _default_tanh_dtype():
    # bf16 EUP exists on v6e/v7x; keep f32 tanh on v5e and older.
    try:
        kind = jax.devices()[0].device_kind.lower()
    except Exception:
        return jnp.float32
    if any(t in kind for t in ("v2", "v3", "v4", "v5")):
        return jnp.float32
    return jnp.bfloat16


def _mia_fusion_kernel(xt_ref, xv_ref, xa_ref,
                       wt_ref, wv_ref, wa_ref, b1_ref, wo_ref, bo_ref,
                       o_ref, *, mm_dtype, tanh_dtype):
    # Per-modality projections: three bf16 MXU matmuls, f32 accumulation.
    # Activations arrive in their HBM dtype and are cast in VMEM.
    h = jnp.dot(xt_ref[...].astype(mm_dtype), wt_ref[...],
                preferred_element_type=jnp.float32)
    h += jnp.dot(xv_ref[...].astype(mm_dtype), wv_ref[...],
                 preferred_element_type=jnp.float32)
    h += jnp.dot(xa_ref[...].astype(mm_dtype), wa_ref[...],
                 preferred_element_type=jnp.float32)
    # Additive fusion: bias add in f32, tanh in the generation-appropriate dtype.
    h = jnp.tanh((h + b1_ref[...]).astype(tanh_dtype))
    # Output projection (bf16 MXU matmul, f32 accumulation) + bias.
    out = jnp.dot(h.astype(mm_dtype), wo_ref[...],
                  preferred_element_type=jnp.float32) + bo_ref[...]
    o_ref[...] = out.astype(o_ref.dtype)


def prepare_params(params, matmul_dtype=jnp.bfloat16):
    """One-time fuse / lane-pad / cast of weights (keep out of the hot path)."""
    H = params["wt"].shape[-1]
    H_pad = _round_up(H, 128)
    pw = lambda w: _pad_to(w, (w.shape[0], H_pad)).astype(matmul_dtype)
    b1 = (params["bt"] + params["bv"] + params["ba"]).reshape(1, H)
    return {
        "wt": pw(params["wt"]),
        "wv": pw(params["wv"]),
        "wa": pw(params["wa"]),
        "wo": _pad_to(params["wo"], (H_pad, H_pad)).astype(matmul_dtype),
        "b1": _pad_to(b1, (1, H_pad)).astype(jnp.float32),
        "bo": _pad_to(params["bo"].reshape(1, H), (1, H_pad)).astype(jnp.float32),
        "hidden": H,
    }


def mia_forward(text_feats, video_data, audio_data, params, *,
                tile_m=None, tanh_dtype=None):
    """text_feats: (B, S, Dt), video_data: (B, S, Dv), audio_data: (B, S, Da)
       params: raw dict (init_params) or prepared dict (prepare_params)
       returns: (B, S, H)
    """
    if "b1" not in params:  # accept raw params; prefer calling prepare_params once
        params = prepare_params(params)

    B, S, Dt = text_feats.shape
    Dv = video_data.shape[-1]
    Da = audio_data.shape[-1]
    H = params["hidden"]
    H_pad = params["wo"].shape[-1]
    mm_dtype = params["wt"].dtype
    out_dtype = text_feats.dtype
    if tanh_dtype is None:
        tanh_dtype = _default_tanh_dtype()

    M = B * S
    K = Dt + Dv + Da
    M_pad = _round_up(M, 8)  # only pad rows to a sublane multiple

    vmem_cap = _vmem_capacity_bytes()
    if tile_m is None:
        # Bigger row tiles on v5e/v6e (128 MiB VMEM), conservative on v7x.
        tile_m = 512 if vmem_cap >= (96 << 20) else 256
    tile_m = max(16, _round_up(int(tile_m), 16))

    # At least two row tiles when possible so ("parallel",) can shard the grid
    # across both TensorCores on v7x.
    if M_pad > 8:
        tile_m_eff = min(tile_m, max(8, _round_up(pl.cdiv(M_pad, 2), 8)))
    else:
        tile_m_eff = 8

    in_isz = jnp.dtype(out_dtype).itemsize
    mm_isz = jnp.dtype(mm_dtype).itemsize
    o_isz = jnp.dtype(out_dtype).itemsize

    def _footprint(tm):
        return (2 * tm * K * in_isz                 # activations (double-buffered)
                + (K + H_pad) * H_pad * mm_isz      # resident weights (single-buffered)
                + 2 * H_pad * 4                     # biases
                + 2 * tm * H_pad * o_isz            # output tile (double-buffered)
                + 2 * tm * H_pad * 4                # f32 intermediates headroom
                + (2 << 20))                        # compiler-internal scratch

    vmem_budget = int(0.85 * vmem_cap)              # never the full physical VMEM
    while tile_m_eff > 16 and _footprint(tile_m_eff) > vmem_budget:
        tile_m_eff = max(16, _round_up(tile_m_eff // 2, 16))
    vmem_limit = int(min(vmem_budget, max(2 * _footprint(tile_m_eff), 32 << 20)))

    grid = (pl.cdiv(M_pad, tile_m_eff),)

    def _prep_x(a, d):
        a = a.reshape(M, d)
        if M_pad != M:
            a = jnp.pad(a, ((0, M_pad - M), (0, 0)))
        return a

    xt = _prep_x(text_feats, Dt)
    xv = _prep_x(video_data, Dv)
    xa = _prep_x(audio_data, Da)

    cost = pl.CostEstimate(
        flops=2 * M_pad * H_pad * (K + H_pad),
        transcendentals=M_pad * H_pad,
        bytes_accessed=(M_pad * K * in_isz
                        + (K + H_pad) * H_pad * mm_isz
                        + 2 * H_pad * 4
                        + M_pad * H_pad * o_isz),
    )

    kernel = functools.partial(_mia_fusion_kernel,
                               mm_dtype=mm_dtype, tanh_dtype=tanh_dtype)

    def _run(resident_kwargs):
        in_specs = [
            pl.BlockSpec((tile_m_eff, Dt), lambda i: (i, 0)),
            pl.BlockSpec((tile_m_eff, Dv), lambda i: (i, 0)),
            pl.BlockSpec((tile_m_eff, Da), lambda i: (i, 0)),
            pl.BlockSpec((Dt, H_pad), lambda i: (0, 0), **resident_kwargs),
            pl.BlockSpec((Dv, H_pad), lambda i: (0, 0), **resident_kwargs),
            pl.BlockSpec((Da, H_pad), lambda i: (0, 0), **resident_kwargs),
            pl.BlockSpec((1, H_pad), lambda i: (0, 0), **resident_kwargs),
            pl.BlockSpec((H_pad, H_pad), lambda i: (0, 0), **resident_kwargs),
            pl.BlockSpec((1, H_pad), lambda i: (0, 0), **resident_kwargs),
        ]
        out_spec = pl.BlockSpec((tile_m_eff, H_pad), lambda i: (i, 0))
        return pl.pallas_call(
            kernel,
            out_shape=jax.ShapeDtypeStruct((M_pad, H_pad), out_dtype),
            grid_spec=pltpu.PrefetchScalarGridSpec(
                num_scalar_prefetch=0,
                grid=grid,
                in_specs=in_specs,
                out_specs=out_spec,
            ),
            compiler_params=pltpu.CompilerParams(
                dimension_semantics=("parallel",),
                vmem_limit_bytes=vmem_limit,
            ),
            cost_estimate=cost,
        )(xt, xv, xa,
          params["wt"], params["wv"], params["wa"],
          params["b1"], params["wo"], params["bo"])

    try:
        # Resident weights/biases: single-buffered (constant index_map, fetched once).
        out = _run({"pipeline_mode": pl.Buffered(1)})
    except Exception:
        # TODO(synk): Buffered(1) unsupported in this jax build; fall back to
        # the default double-buffered pipelining for the resident operands.
        out = _run({})

    if M_pad != M or H_pad != H:
        out = out[:M, :H]
    return out.reshape(B, S, H)


def init_params(key, Dt, Dv, Da, H, dtype=jnp.float32):
    ks = jax.random.split(key, 4)
    scale = 0.02
    return {
        "wt": (scale * jax.random.normal(ks[0], (Dt, H))).astype(dtype),
        "wv": (scale * jax.random.normal(ks[1], (Dv, H))).astype(dtype),
        "wa": (scale * jax.random.normal(ks[2], (Da, H))).astype(dtype),
        "bt": jnp.zeros((1, H), dtype),
        "bv": jnp.zeros((1, H), dtype),
        "ba": jnp.zeros((1, H), dtype),
        "wo": (scale * jax.random.normal(ks[3], (H, H))).astype(dtype),
        "bo": jnp.zeros((1, H), dtype),
    }


def mia_reference(text_feats, video_data, audio_data, params,
                  matmul_dtype=jnp.float32, tanh_dtype=jnp.float32):
    """Pure-JAX reference (per-modality projections, as the module implies).

    `matmul_dtype` / `tanh_dtype` let the test match the kernel's precision.
    """
    B, S, _ = text_feats.shape
    c = lambda a: a.astype(matmul_dtype)
    t_p = jnp.dot(c(text_feats.reshape(B * S, -1)), c(params["wt"]),
                  preferred_element_type=jnp.float32) + params["bt"]
    v_p = jnp.dot(c(video_data.reshape(B * S, -1)), c(params["wv"]),
                  preferred_element_type=jnp.float32) + params["bv"]
    a_p = jnp.dot(c(audio_data.reshape(B * S, -1)), c(params["wa"]),
                  preferred_element_type=jnp.float32) + params["ba"]
    h = jnp.tanh((t_p + v_p + a_p).astype(tanh_dtype)).astype(matmul_dtype)
    out = jnp.dot(h, c(params["wo"]),
                  preferred_element_type=jnp.float32) + params["bo"]
    H = params["wt"].shape[-1]
    return out.reshape(B, S, H).astype(text_feats.dtype)


if __name__ == "__main__":
    key = jax.random.PRNGKey(0)
    B, S = 2, 8
    Dt, Dv, Da, H = 32, 32, 32, 32

    k_t, k_v, k_a, k_p = jax.random.split(key, 4)
    text_feats = jax.random.normal(k_t, (B, S, Dt), dtype=jnp.float32)
    video_data = jax.random.normal(k_v, (B, S, Dv), dtype=jnp.float32)
    audio_data = jax.random.normal(k_a, (B, S, Da), dtype=jnp.float32)

    params = init_params(k_p, Dt, Dv, Da, H)
    prepared = prepare_params(params)          # one-time weight fuse/pad/cast
    tanh_dtype = _default_tanh_dtype()

    out = mia_forward(text_feats, video_data, audio_data, prepared,
                      tanh_dtype=tanh_dtype)
    out = jax.block_until_ready(out)
    assert out.shape == (B, S, H)

    # Precision-matched reference (bf16 matmuls, matching tanh dtype).
    ref_bf16 = mia_reference(text_feats, video_data, audio_data, params,
                             matmul_dtype=jnp.bfloat16, tanh_dtype=tanh_dtype)
    assert jnp.allclose(out, ref_bf16, atol=2e-3, rtol=2e-3), \
        "mismatch vs precision-matched reference"

    # Loose check against the full-f32 module semantics.
    ref_f32 = mia_reference(text_feats, video_data, audio_data, params,
                            matmul_dtype=jnp.float32, tanh_dtype=jnp.float32)
    assert jnp.allclose(out, ref_f32, atol=5e-2, rtol=5e-2), \
        "mismatch vs f32 reference"

    print("KERNEL_OK")
</pallas_src>

<mosaic_0001>
module attributes {stable_mosaic.version = 11 : i64} {
  func.func @_mia_fusion_kernel(%arg0: i32, %arg1: memref<8x32xf32, #tpu.memory_space<vmem>>, %arg2: memref<8x32xf32, #tpu.memory_space<vmem>>, %arg3: memref<8x32xf32, #tpu.memory_space<vmem>>, %arg4: memref<32x128xbf16, #tpu.memory_space<vmem>>, %arg5: memref<32x128xbf16, #tpu.memory_space<vmem>>, %arg6: memref<32x128xbf16, #tpu.memory_space<vmem>>, %arg7: memref<1x128xf32, #tpu.memory_space<vmem>>, %arg8: memref<128x128xbf16, #tpu.memory_space<vmem>>, %arg9: memref<1x128xf32, #tpu.memory_space<vmem>>, %arg10: memref<8x128xf32, #tpu.memory_space<vmem>>) attributes {dimension_semantics = [#tpu.dimension_semantics<parallel>], iteration_bounds = array<i64: 2>, scalar_prefetch = 0 : i64, scratch_operands = 0 : i64, tpu.core_type = #tpu.core_type<tc>, window_params = [{transform_indices = @transform_0, window_bounds = array<i64: 8, 32>}, {transform_indices = @transform_1, window_bounds = array<i64: 8, 32>}, {transform_indices = @transform_2, window_bounds = array<i64: 8, 32>}, {pipeline_mode = #tpu.pipeline_mode<synchronous>, transform_indices = @transform_3, window_bounds = array<i64: 32, 128>}, {pipeline_mode = #tpu.pipeline_mode<synchronous>, transform_indices = @transform_4, window_bounds = array<i64: 32, 128>}, {pipeline_mode = #tpu.pipeline_mode<synchronous>, transform_indices = @transform_5, window_bounds = array<i64: 32, 128>}, {pipeline_mode = #tpu.pipeline_mode<synchronous>, transform_indices = @transform_6, window_bounds = array<i64: 1, 128>}, {pipeline_mode = #tpu.pipeline_mode<synchronous>, transform_indices = @transform_7, window_bounds = array<i64: 128, 128>}, {pipeline_mode = #tpu.pipeline_mode<synchronous>, transform_indices = @transform_8, window_bounds = array<i64: 1, 128>}, {transform_indices = @transform_9, window_bounds = array<i64: 8, 128>}]} {
    %c0 = arith.constant 0 : index
    %c0_0 = arith.constant 0 : index
    %0 = vector.load %arg1[%c0, %c0_0] : memref<8x32xf32, #tpu.memory_space<vmem>>, vector<8x32xf32>
    %1 = arith.truncf %0 : vector<8x32xf32> to vector<8x32xbf16>
    %c0_1 = arith.constant 0 : index
    %c0_2 = arith.constant 0 : index
    %2 = vector.load %arg4[%c0_1, %c0_2] : memref<32x128xbf16, #tpu.memory_space<vmem>>, vector<32x128xbf16>
    %cst = arith.constant dense<0.000000e+00> : vector<8x128xf32>
    %3 = tpu.matmul %1, %2, %cst {dimension_numbers = #tpu.dot_dimension_numbers<[1], [0], [0], [1], [0, 0, 1, 1], [], []>} : vector<8x32xbf16>, vector<32x128xbf16>, vector<8x128xf32> -> vector<8x128xf32>
    %c0_3 = arith.constant 0 : index
    %c0_4 = arith.constant 0 : index
    %4 = vector.load %arg2[%c0_3, %c0_4] : memref<8x32xf32, #tpu.memory_space<vmem>>, vector<8x32xf32>
    %5 = arith.truncf %4 : vector<8x32xf32> to vector<8x32xbf16>
    %c0_5 = arith.constant 0 : index
    %c0_6 = arith.constant 0 : index
    %6 = vector.load %arg5[%c0_5, %c0_6] : memref<32x128xbf16, #tpu.memory_space<vmem>>, vector<32x128xbf16>
    %cst_7 = arith.constant dense<0.000000e+00> : vector<8x128xf32>
    %7 = tpu.matmul %5, %6, %cst_7 {dimension_numbers = #tpu.dot_dimension_numbers<[1], [0], [0], [1], [0, 0, 1, 1], [], []>} : vector<8x32xbf16>, vector<32x128xbf16>, vector<8x128xf32> -> vector<8x128xf32>
    %8 = arith.addf %3, %7 : vector<8x128xf32>
    %c0_8 = arith.constant 0 : index
    %c0_9 = arith.constant 0 : index
    %9 = vector.load %arg3[%c0_8, %c0_9] : memref<8x32xf32, #tpu.memory_space<vmem>>, vector<8x32xf32>
    %10 = arith.truncf %9 : vector<8x32xf32> to vector<8x32xbf16>
    %c0_10 = arith.constant 0 : index
    %c0_11 = arith.constant 0 : index
    %11 = vector.load %arg6[%c0_10, %c0_11] : memref<32x128xbf16, #tpu.memory_space<vmem>>, vector<32x128xbf16>
    %cst_12 = arith.constant dense<0.000000e+00> : vector<8x128xf32>
    %12 = tpu.matmul %10, %11, %cst_12 {dimension_numbers = #tpu.dot_dimension_numbers<[1], [0], [0], [1], [0, 0, 1, 1], [], []>} : vector<8x32xbf16>, vector<32x128xbf16>, vector<8x128xf32> -> vector<8x128xf32>
    %13 = arith.addf %8, %12 : vector<8x128xf32>
    %c0_13 = arith.constant 0 : index
    %c0_14 = arith.constant 0 : index
    %14 = vector.load %arg7[%c0_13, %c0_14] : memref<1x128xf32, #tpu.memory_space<vmem>>, vector<1x128xf32>
    %15 = vector.broadcast %14 : vector<1x128xf32> to vector<8x128xf32>
    %16 = arith.addf %13, %15 : vector<8x128xf32>
    %17 = arith.truncf %16 : vector<8x128xf32> to vector<8x128xbf16>
    %18 = math.tanh %17 : vector<8x128xbf16>
    %c0_15 = arith.constant 0 : index
    %c0_16 = arith.constant 0 : index
    %19 = vector.load %arg8[%c0_15, %c0_16] : memref<128x128xbf16, #tpu.memory_space<vmem>>, vector<128x128xbf16>
    %cst_17 = arith.constant dense<0.000000e+00> : vector<8x128xf32>
    %20 = tpu.matmul %18, %19, %cst_17 {dimension_numbers = #tpu.dot_dimension_numbers<[1], [0], [0], [1], [0, 0, 1, 1], [], []>} : vector<8x128xbf16>, vector<128x128xbf16>, vector<8x128xf32> -> vector<8x128xf32>
    %c0_18 = arith.constant 0 : index
    %c0_19 = arith.constant 0 : index
    %21 = vector.load %arg9[%c0_18, %c0_19] : memref<1x128xf32, #tpu.memory_space<vmem>>, vector<1x128xf32>
    %22 = vector.broadcast %21 : vector<1x128xf32> to vector<8x128xf32>
    %23 = arith.addf %20, %22 : vector<8x128xf32>
    %c0_20 = arith.constant 0 : index
    %c0_21 = arith.constant 0 : index
    %24 = vector.load %arg10[%c0_20, %c0_21] : memref<8x128xf32, #tpu.memory_space<vmem>>, vector<8x128xf32>
    tpu.vector_store %arg10[%c0_20, %c0_21], %23 {strides = array<i32>} : memref<8x128xf32, #tpu.memory_space<vmem>>, vector<8x128xf32>,
    return
  }
  func.func @transform_0(%arg0: i32) -> (i32, i32) {
    %c0_i32 = arith.constant 0 : i32
    %c0_i32_0 = arith.constant 0 : i32
    return %arg0, %c0_i32 : i32, i32
  }
  func.func @transform_1(%arg0: i32) -> (i32, i32) {
    %c0_i32 = arith.constant 0 : i32
    %c0_i32_0 = arith.constant 0 : i32
    return %arg0, %c0_i32 : i32, i32
  }
  func.func @transform_2(%arg0: i32) -> (i32, i32) {
    %c0_i32 = arith.constant 0 : i32
    %c0_i32_0 = arith.constant 0 : i32
    return %arg0, %c0_i32 : i32, i32
  }
  func.func @transform_3(%arg0: i32) -> (i32, i32) {
    %c0_i32 = arith.constant 0 : i32
    %c0_i32_0 = arith.constant 0 : i32
    %c0_i32_1 = arith.constant 0 : i32
    return %c0_i32, %c0_i32_0 : i32, i32
  }
  func.func @transform_4(%arg0: i32) -> (i32, i32) {
    %c0_i32 = arith.constant 0 : i32
    %c0_i32_0 = arith.constant 0 : i32
    %c0_i32_1 = arith.constant 0 : i32
    return %c0_i32, %c0_i32_0 : i32, i32
  }
  func.func @transform_5(%arg0: i32) -> (i32, i32) {
    %c0_i32 = arith.constant 0 : i32
    %c0_i32_0 = arith.constant 0 : i32
    %c0_i32_1 = arith.constant 0 : i32
    return %c0_i32, %c0_i32_0 : i32, i32
  }
  func.func @transform_6(%arg0: i32) -> (i32, i32) {
    %c0_i32 = arith.constant 0 : i32
    %c0_i32_0 = arith.constant 0 : i32
    %c0_i32_1 = arith.constant 0 : i32
    return %c0_i32, %c0_i32_0 : i32, i32
  }
  func.func @transform_7(%arg0: i32) -> (i32, i32) {
    %c0_i32 = arith.constant 0 : i32
    %c0_i32_0 = arith.constant 0 : i32
    %c0_i32_1 = arith.constant 0 : i32
    return %c0_i32, %c0_i32_0 : i32, i32
  }
  func.func @transform_8(%arg0: i32) -> (i32, i32) {
    %c0_i32 = arith.constant 0 : i32
    %c0_i32_0 = arith.constant 0 : i32
    %c0_i32_1 = arith.constant 0 : i32
    return %c0_i32, %c0_i32_0 : i32, i32
  }
  func.func @transform_9(%arg0: i32) -> (i32, i32) {
    %c0_i32 = arith.constant 0 : i32
    %c0_i32_0 = arith.constant 0 : i32
    return %arg0, %c0_i32 : i32, i32
  }
}

module attributes {stable_mosaic.version = 11 : i64} {
  func.func @_mia_fusion_kernel(%arg0: i32, %arg1: memref<8x32xf32, #tpu.memory_space<vmem>>, %arg2: memref<8x32xf32, #tpu.memory_space<vmem>>, %arg3: memref<8x32xf32, #tpu.memory_space<vmem>>, %arg4: memref<32x128xbf16, #tpu.memory_space<vmem>>, %arg5: memref<32x128xbf16, #tpu.memory_space<vmem>>, %arg6: memref<32x128xbf16, #tpu.memory_space<vmem>>, %arg7: memref<1x128xf32, #tpu.memory_space<vmem>>, %arg8: memref<128x128xbf16, #tpu.memory_space<vmem>>, %arg9: memref<1x128xf32, #tpu.memory_space<vmem>>, %arg10: memref<8x128xf32, #tpu.memory_space<vmem>>) attributes {dimension_semantics = [#tpu.dimension_semantics<parallel>], iteration_bounds = array<i64: 2>, scalar_prefetch = 0 : i64, scratch_operands = 0 : i64, tpu.core_type = #tpu.core_type<tc>, window_params = [{transform_indices = @transform_0, window_bounds = array<i64: 8, 32>}, {transform_indices = @transform_1, window_bounds = array<i64: 8, 32>}, {transform_indices = @transform_2, window_bounds = array<i64: 8, 32>}, {pipeline_mode = #tpu.pipeline_mode<synchronous>, transform_indices = @transform_3, window_bounds = array<i64: 32, 128>}, {pipeline_mode = #tpu.pipeline_mode<synchronous>, transform_indices = @transform_4, window_bounds = array<i64: 32, 128>}, {pipeline_mode = #tpu.pipeline_mode<synchronous>, transform_indices = @transform_5, window_bounds = array<i64: 32, 128>}, {pipeline_mode = #tpu.pipeline_mode<synchronous>, transform_indices = @transform_6, window_bounds = array<i64: 1, 128>}, {pipeline_mode = #tpu.pipeline_mode<synchronous>, transform_indices = @transform_7, window_bounds = array<i64: 128, 128>}, {pipeline_mode = #tpu.pipeline_mode<synchronous>, transform_indices = @transform_8, window_bounds = array<i64: 1, 128>}, {transform_indices = @transform_9, window_bounds = array<i64: 8, 128>}]} {
    %c0 = arith.constant 0 : index
    %c0_0 = arith.constant 0 : index
    %0 = vector.load %arg1[%c0, %c0_0] : memref<8x32xf32, #tpu.memory_space<vmem>>, vector<8x32xf32>
    %1 = arith.truncf %0 : vector<8x32xf32> to vector<8x32xbf16>
    %c0_1 = arith.constant 0 : index
    %c0_2 = arith.constant 0 : index
    %2 = vector.load %arg4[%c0_1, %c0_2] : memref<32x128xbf16, #tpu.memory_space<vmem>>, vector<32x128xbf16>
    %cst = arith.constant dense<0.000000e+00> : vector<8x128xf32>
    %3 = tpu.matmul %1, %2, %cst {dimension_numbers = #tpu.dot_dimension_numbers<[1], [0], [0], [1], [0, 0, 1, 1], [], []>} : vector<8x32xbf16>, vector<32x128xbf16>, vector<8x128xf32> -> vector<8x128xf32>
    %c0_3 = arith.constant 0 : index
    %c0_4 = arith.constant 0 : index
    %4 = vector.load %arg2[%c0_3, %c0_4] : memref<8x32xf32, #tpu.memory_space<vmem>>, vector<8x32xf32>
    %5 = arith.truncf %4 : vector<8x32xf32> to vector<8x32xbf16>
    %c0_5 = arith.constant 0 : index
    %c0_6 = arith.constant 0 : index
    %6 = vector.load %arg5[%c0_5, %c0_6] : memref<32x128xbf16, #tpu.memory_space<vmem>>, vector<32x128xbf16>
    %cst_7 = arith.constant dense<0.000000e+00> : vector<8x128xf32>
    %7 = tpu.matmul %5, %6, %cst_7 {dimension_numbers = #tpu.dot_dimension_numbers<[1], [0], [0], [1], [0, 0, 1, 1], [], []>} : vector<8x32xbf16>, vector<32x128xbf16>, vector<8x128xf32> -> vector<8x128xf32>
    %8 = arith.addf %3, %7 : vector<8x128xf32>
    %c0_8 = arith.constant 0 : index
    %c0_9 = arith.constant 0 : index
    %9 = vector.load %arg3[%c0_8, %c0_9] : memref<8x32xf32, #tpu.memory_space<vmem>>, vector<8x32xf32>
    %10 = arith.truncf %9 : vector<8x32xf32> to vector<8x32xbf16>
    %c0_10 = arith.constant 0 : index
    %c0_11 = arith.constant 0 : index
    %11 = vector.load %arg6[%c0_10, %c0_11] : memref<32x128xbf16, #tpu.memory_space<vmem>>, vector<32x128xbf16>
    %cst_12 = arith.constant dense<0.000000e+00> : vector<8x128xf32>
    %12 = tpu.matmul %10, %11, %cst_12 {dimension_numbers = #tpu.dot_dimension_numbers<[1], [0], [0], [1], [0, 0, 1, 1], [], []>} : vector<8x32xbf16>, vector<32x128xbf16>, vector<8x128xf32> -> vector<8x128xf32>
    %13 = arith.addf %8, %12 : vector<8x128xf32>
    %c0_13 = arith.constant 0 : index
    %c0_14 = arith.constant 0 : index
    %14 = vector.load %arg7[%c0_13, %c0_14] : memref<1x128xf32, #tpu.memory_space<vmem>>, vector<1x128xf32>
    %15 = vector.broadcast %14 : vector<1x128xf32> to vector<8x128xf32>
    %16 = arith.addf %13, %15 : vector<8x128xf32>
    %17 = arith.truncf %16 : vector<8x128xf32> to vector<8x128xbf16>
    %18 = math.tanh %17 : vector<8x128xbf16>
    %c0_15 = arith.constant 0 : index
    %c0_16 = arith.constant 0 : index
    %19 = vector.load %arg8[%c0_15, %c0_16] : memref<128x128xbf16, #tpu.memory_space<vmem>>, vector<128x128xbf16>
    %cst_17 = arith.constant dense<0.000000e+00> : vector<8x128xf32>
    %20 = tpu.matmul %18, %19, %cst_17 {dimension_numbers = #tpu.dot_dimension_numbers<[1], [0], [0], [1], [0, 0, 1, 1], [], []>} : vector<8x128xbf16>, vector<128x128xbf16>, vector<8x128xf32> -> vector<8x128xf32>
    %c0_18 = arith.constant 0 : index
    %c0_19 = arith.constant 0 : index
    %21 = vector.load %arg9[%c0_18, %c0_19] : memref<1x128xf32, #tpu.memory_space<vmem>>, vector<1x128xf32>
    %22 = vector.broadcast %21 : vector<1x128xf32> to vector<8x128xf32>
    %23 = arith.addf %20, %22 : vector<8x128xf32>
    %c0_20 = arith.constant 0 : index
    %c0_21 = arith.constant 0 : index
    %24 = vector.load %arg10[%c0_20, %c0_21] : memref<8x128xf32, #tpu.memory_space<vmem>>, vector<8x128xf32>
    tpu.vector_store %arg10[%c0_20, %c0_21], %23 {strides = array<i32>} : memref<8x128xf32, #tpu.memory_space<vmem>>, vector<8x128xf32>,
    return
  }
  func.func @transform_0(%arg0: i32) -> (i32, i32) {
    %c0_i32 = arith.constant 0 : i32
    %c0_i32_0 = arith.constant 0 : i32
    return %arg0, %c0_i32 : i32, i32
  }
  func.func @transform_1(%arg0: i32) -> (i32, i32) {
    %c0_i32 = arith.constant 0 : i32
    %c0_i32_0 = arith.constant 0 : i32
    return %arg0, %c0_i32 : i32, i32
  }
  func.func @transform_2(%arg0: i32) -> (i32, i32) {
    %c0_i32 = arith.constant 0 : i32
    %c0_i32_0 = arith.constant 0 : i32
    return %arg0, %c0_i32 : i32, i32
  }
  func.func @transform_3(%arg0: i32) -> (i32, i32) {
    %c0_i32 = arith.constant 0 : i32
    %c0_i32_0 = arith.constant 0 : i32
    %c0_i32_1 = arith.constant 0 : i32
    return %c0_i32, %c0_i32_0 : i32, i32
  }
  func.func @transform_4(%arg0: i32) -> (i32, i32) {
    %c0_i32 = arith.constant 0 : i32
    %c0_i32_0 = arith.constant 0 : i32
    %c0_i32_1 = arith.constant 0 : i32
    return %c0_i32, %c0_i32_0 : i32, i32
  }
  func.func @transform_5(%arg0: i32) -> (i32, i32) {
    %c0_i32 = arith.constant 0 : i32
    %c0_i32_0 = arith.constant 0 : i32
    %c0_i32_1 = arith.constant 0 : i32
    return %c0_i32, %c0_i32_0 : i32, i32
  }
  func.func @transform_6(%arg0: i32) -> (i32, i32) {
    %c0_i32 = arith.constant 0 : i32
    %c0_i32_0 = arith.constant 0 : i32
    %c0_i32_1 = arith.constant 0 : i32
    return %c0_i32, %c0_i32_0 : i32, i32
  }
  func.func @transform_7(%arg0: i32) -> (i32, i32) {
    %c0_i32 = arith.constant 0 : i32
    %c0_i32_0 = arith.constant 0 : i32
    %c0_i32_1 = arith.constant 0 : i32
    return %c0_i32, %c0_i32_0 : i32, i32
  }
  func.func @transform_8(%arg0: i32) -> (i32, i32) {
    %c0_i32 = arith.constant 0 : i32
    %c0_i32_0 = arith.constant 0 : i32
    %c0_i32_1 = arith.constant 0 : i32
    return %c0_i32, %c0_i32_0 : i32, i32
  }
  func.func @transform_9(%arg0: i32) -> (i32, i32) {
    %c0_i32 = arith.constant 0 : i32
    %c0_i32_0 = arith.constant 0 : i32
    return %arg0, %c0_i32 : i32, i32
  }
}

</mosaic_0001>

<bundles_post_ra>
// kernel: tpu_custom_call.1
= control target key start
LH: loop header
LB: loop body
LE: loop exit
PB: predicated region body
PF: predicated region fallthrough
CT: control target
= control target key end

     0   :  { %s1810_s0 = inlined_call_operand.hbm [shape: f32[16,32], index: 0, kind: input, shape index: {}]   ;;  %s1811_s1 = inlined_call_operand.hbm [shape: f32[16,32], index: 1, kind: input, shape index: {}]   ;;  %s1812_s2 = inlined_call_operand.hbm [shape: f32[16,32], index: 2, kind: input, shape index: {}]   ;;  %s1813_s3 = inlined_call_operand.hbm [shape: bf16[32,128], index: 3, kind: input, shape index: {}]   ;;  %s1814_s4 = inlined_call_operand.hbm [shape: bf16[32,128], index: 4, kind: input, shape index: {}]   ;;  %s1815_s5 = inlined_call_operand.vmem [shape: bf16[32,128], index: 5, kind: input, shape index: {}]   ;;  %s1816_s6 = inlined_call_operand.vmem [shape: f32[1,128], index: 6, kind: input, shape index: {}]   ;;  %s1817_s7 = inlined_call_operand.hbm [shape: bf16[128,128], index: 7, kind: input, shape index: {}]   ;;  %s1818_s8 = inlined_call_operand.vmem [shape: f32[1,128], index: 8, kind: input, shape index: {}]   ;;  %s1819_s9 = inlined_call_operand.hbm [shape: f32[16,128], index: 9, kind: output, shape index: {}]  }
   0x1   :  { %1845 = sst [smem:[#allocation25_spill]] %s1811_s1 }
   0x2   :  { %1846 = sst [smem:[#allocation26_spill]] %s1813_s3 }
   0x3   :  { %1847 = sst [smem:[#allocation27_spill]] %s1818_s8 }
   0x4   :  { %1848 = sst [smem:[#allocation28_spill]] %s1819_s9 }
   0x5   :  { %14 = vsyncpa [#allocation3], 0 }
   0x6   :  { %16 = vsyncpa [#allocation3 + $0x1], 0 }
   0x7   :  { %17 = vsyncpa [#allocation6], 0 }
   0x8   :  { %19 = vsyncpa [#allocation6 + $0x1], 0 }
   0x9   :  { %20 = vsyncpa [#allocation9], 0 }
   0xa   :  { %21 = vsyncpa [#allocation12], 0 }
   0xb   :  { %22 = vsyncpa [#allocation4], 0 }
   0xc   :  { %24 = vsyncpa [#allocation4 + $0x1], 0  ;;  %s1454_s30 = smov 0   ;;  %s1456_s10 = smov 0  }
   0xd   :  { %s1458_s11 = smov 0   ;;  %s1460_s12 = smov 0  }
   0xe LB: > { %1849 = sst [smem:[#allocation19_spill]] %s1379_s30  ;;  %s1475_s13 = sadd.s32 4294967295, %s1391_s12   ;;  %s1391_s12 = sphi %s1460_s12, %s1889_s12   ;;  %s1387_s11 = sphi %s1458_s11, %s1893_s11   ;;  %s1383_s10 = sphi %s1456_s10, %s1892_s10   ;;  %s1379_s30 = sphi %s1454_s30, %s1891_s30  }
   0xf   : > { %1850 = sst [smem:[#allocation20_spill]] %s1391_s12  ;;  %s927_s14 = sadd.s32 4294967294, %s1391_s12  }
  0x10   : > { %p50_p0 = scmp.ne.s32.totalorder %s1383_s10, %s1379_s30  ;;  %p1820_p1 = scmp.eq.s32.totalorder %s1475_s13, 0 }
  0x11   : > { %p258_p3 = scmp.eq.s32.totalorder %s927_s14, 1  ;;  %p928_p5 = scmp.ge.s32.totalorder %s1391_s12, 1 }
  0x12   : > { %p1484_p4 = por %p1820_p1, %p50_p0  ;;  %p265_p7 = scmp.lt.s32.totalorder %s1391_s12, 3 }
  0x13   : > { %p1489_p6 = por %p258_p3, %p50_p0  ;;  %s1393_s18 = smov [#allocation8]  }
  0x14   : > { %s1851_s15 = scalar_select %p1484_p4, 1, 0 }
  0x15   : > { %s1852_s16 = scalar_select %p1489_p6, 1, 0 }
  0x16   : > { %p1494_p8 = pnand %p928_p5, %p265_p7  ;;  %s277_s19 = sshll.u32 %s1393_s18, 4  ;;  %s1498_s19 = int_to_ptr.vmem [resolvable:$true] %s277_s19 }
  0x17   : > { %1853 = sst [smem:[#allocation21_spill]] %s1852_s16  ;;  %s1510_s21 = sadd.s32 1, %s1391_s12  }
  0x18   : > { %s1854_s17 = scalar_select %p1494_p8, 1, 0 }
  0x19   : > { %p1052_p9 = pneg %p1494_p8  ;;  %1856 = sst [smem:[#allocation22_spill]] %s1510_s21 }
  0x1a   : > { %s37_s22 = sadd.s32 1, %s1387_s11  ;;  %s34_s23 = ssub.s32 %s1391_s12, %s1510_s21 }
  0x1b   : > { %p1505_p11 = pnand %p1052_p9, %p1820_p1  ;;  %s1857_s3 = sld [smem:[#allocation26_spill]] }
  0x1d   : > { %s1855_s20 = scalar_select %p1505_p11, 1, 0 }
  0x1e   : > { %p1523_p13 = pneg %p1505_p11 }
  0x20   : > { %s1858_s29 = scalar_select %p1523_p13, 1, 0 }
  0x21   : > { %s1139_s26 = scalar_lea.hbm %s1857_s3, 256 }
  0x22   : > { %p1140_p12 = scmp.ne.s32.totalorder %s1857_s3, %s1139_s26  ;;  %p1146_p5 = scmp.lt.u32.totalorder %s1139_s26, %s1857_s3 }
  0x24   : > { %p1142_p0 = pnand %p1523_p13, %p1140_p12 }
  0x26   : > { %p1143_p3 = pneg %p1142_p0 }
  0x28   : > { %p1148_p7 = pnand %p1146_p5, %p1143_p3 }
  0x2a   : > { %1151 = shalt.err (!%p1148_p7)
}
  0x2b   : > { %s1152_s24 = scalar_lea.vmem %s1498_s19, 256  ;;  %p1160_p2 = scmp.lt.s32.totalorder %s1498_s19, %s1498_s19 }
  0x2c   : > { %p1153_p9 = scmp.ne.s32.totalorder %s1498_s19, %s1152_s24  ;;  %p1161_p6 = scmp.lt.s32.totalorder %s1152_s24, %s1152_s24 }
  0x2e   : > { %p1155_p10 = pnand %p1153_p9, %p1523_p13  ;;  %p1162_p12 = por %p1161_p6, %p1160_p2 }
  0x30   : > { %p1156_p1 = pneg %p1155_p10 }
  0x32   : > { %p1163_p0 = pnand %p1162_p12, %p1156_p1 }
  0x34   : > { %1166 = shalt.err (!%p1163_p0)
}
  0x35   : > { %s1824_s25 = smov 64   ;;  %s1826_s26 = smov 4  }
  0x36   : > { %1055 = dma.hbm_to_vmem [thread:$0]  (!%p1505_p11), %s1857_s3, 256, %s1498_s19, [#allocation9], %s1824_s25, %s1824_s25, %s1826_s26  }
  0x37   : > { %p35_p1 = scmp.eq.s32.totalorder %s34_s23, 0  ;;  %p44_p2 = scmp.ne.s32.totalorder %s1387_s11, %s1383_s10 }
  0x38   : > { %p45_p6 = scmp.eq.s32.totalorder %s1391_s12, 0  ;;  %p1079_p10 = scmp.lt.s32.totalorder %s1391_s12, 2 }
  0x39   : > { %s1552_s14 = scalar_select %p35_p1, %s1387_s11, %s37_s22  }
  0x3a   : > { %p46_p3 = por %p45_p6, %p44_p2  ;;  %p1860_p5 = scmp.eq.s32.totalorder %s1475_s13, 1 }
  0x3b   : > { %1859 = sst [smem:[#allocation23_spill]] %s1552_s14  ;;  %s1828_s24 = sand.u32 1, %s1387_s11  }
  0x3c   : > { %p1556_p7 = por %p1860_p5, %p44_p2  ;;  %s1562_s21 = sshll.u32 %s1391_s12, 7 }
  0x3d   : > { %s1566_s16 = sshll.u32 %s1828_s24, 3  ;;  %p1568_p9 = pnand %p1079_p10, %p46_p3 }
  0x3e   : > { %s1861_s18 = scalar_select %p1556_p7, 1, 0 }
  0x3f   : > { %s1863_s19 = scalar_select %p1568_p9, 1, 0 }
  0x40   : > { %1862 = sst [smem:[#allocation24_spill]] %s1861_s18  ;;  %s344_s22 = sand.u32 1, %s1391_s12  }
  0x41   : > { %s1864_s1 = sld [smem:[#allocation25_spill]]  ;;  %s348_s25 = scalar_lea.vmem [#allocation5], %s1566_s16 }
  0x42   : > { %s355_s26 = sshll.u32 %s348_s25, 4  ;;  %s1582_s24 = scalar_lea.sflag [#allocation6], %s344_s22  ;;  %s1580_s26 = int_to_ptr.vmem [resolvable:$true] %s355_s26 }
  0x43   : > { %p1588_p0 = pneg %p1568_p9 }
  0x45   : > { %s1865_s14 = scalar_select %p1588_p0, 1, 0 }
  0x47   : > { %s1577_s28 = scalar_lea.hbm %s1864_s1, %s1562_s21  ;;  %s1172_s12 = scalar_lea.hbm %s1864_s1, 256 }
  0x48   : > { %s1167_s3 = scalar_lea.hbm %s1577_s28, 128  ;;  %p1173_p6 = scmp.lt.u32.totalorder %s1577_s28, %s1864_s1 }
  0x49   : > { %p1168_p12 = scmp.ne.s32.totalorder %s1577_s28, %s1167_s3  ;;  %p1174_p10 = scmp.lt.u32.totalorder %s1172_s12, %s1167_s3 }
  0x4a   : > { %p1176_p5 = scmp.lt.u32.totalorder %s1167_s3, %s1577_s28 }
  0x4b   : > { %p1170_p1 = pnand %p1588_p0, %p1168_p12  ;;  %p1175_p3 = por %p1174_p10, %p1173_p6 }
  0x4d   : > { %p1171_p2 = pneg %p1170_p1  ;;  %p1177_p7 = por %p1176_p5, %p1175_p3 }
  0x4f   : > { %p1178_p4 = pnand %p1177_p7, %p1171_p2 }
  0x51   : > { %1181 = shalt.err (!%p1178_p4)
}
  0x52   : > { %s1182_s22 = scalar_lea.vmem %s1580_s26, 128  ;;  %s1396_s23 = smov [#allocation5]  }
  0x53   : > { %p1183_p12 = scmp.ne.s32.totalorder %s1580_s26, %s1182_s22  ;;  %s1187_s27 = sshll.u32 %s1396_s23, 4  ;;  %s1188_s27 = int_to_ptr.vmem [resolvable:$false] %s1187_s27 }
  0x54   : > { %s1189_s30 = scalar_lea.vmem %s1188_s27, 256  ;;  %p1190_p11 = scmp.lt.s32.totalorder %s1580_s26, %s1188_s27 }
  0x55   : > { %p1185_p1 = pnand %p1183_p12, %p1588_p0  ;;  %p1191_p13 = scmp.lt.s32.totalorder %s1189_s30, %s1182_s22 }
  0x57   : > { %p1186_p8 = pneg %p1185_p1  ;;  %p1192_p6 = por %p1191_p13, %p1190_p11 }
  0x59   : > { %p1193_p10 = pnand %p1192_p6, %p1186_p8 }
  0x5b   : > { %1196 = shalt.err (!%p1193_p10)
}
  0x5c   : > { %1068 = dma.hbm_to_vmem [thread:$0]  (!%p1568_p9), %s1577_s28, 128, %s1580_s26, %s1582_s24  }
  0x5d   : > { %s1397_s3 = smov [#allocation10]   ;;  %s1398_s25 = smov [#allocation11]  }
  0x5e   : > { %s290_s12 = sshll.u32 %s1397_s3, 4  ;;  %s309_s1 = sshll.u32 %s1398_s25, 4  ;;  %s291_s12 = int_to_ptr.vmem [resolvable:$true] %s290_s12  ;;  %s310_s1 = int_to_ptr.vmem [resolvable:$true] %s309_s1 }
  0x5f   : > { %s1197_s27 = scalar_lea.hbm %s1814_s4, 256  ;;  %p1866_p8 = scmp.ne.s32.totalorder %s1858_s29, 0 }
  0x60   : > { %p1198_p4 = scmp.ne.s32.totalorder %s1814_s4, %s1197_s27  ;;  %p1204_p7 = scmp.lt.u32.totalorder %s1197_s27, %s1814_s4 }
  0x62   : > { %p1200_p11 = pnand %p1198_p4, %p1866_p8 }
  0x64   : > { %p1201_p13 = pneg %p1200_p11 }
  0x66   : > { %p1206_p2 = pnand %p1204_p7, %p1201_p13 }
  0x68   : > { %1209 = shalt.err (!%p1206_p2)
}
  0x69   : > { %s1210_s26 = scalar_lea.vmem %s291_s12, 256  ;;  %p1218_p1 = scmp.lt.s32.totalorder %s291_s12, %s291_s12 }
  0x6a   : > { %p1211_p3 = scmp.ne.s32.totalorder %s291_s12, %s1210_s26  ;;  %p1219_p6 = scmp.lt.s32.totalorder %s1210_s26, %s1210_s26 }
  0x6c   : > { %p1213_p5 = pnand %p1211_p3, %p1866_p8  ;;  %p1220_p10 = por %p1219_p6, %p1218_p1 }
  0x6e   : > { %p1214_p12 = pneg %p1213_p5 }
  0x70   : > { %p1221_p9 = pnand %p1220_p10, %p1214_p12 }
  0x72   : > { %1224 = shalt.err (!%p1221_p9)
}
  0x73   : > { %p1867_p4 = scmp.ne.s32.totalorder %s1855_s20, 0  ;;  %s1868_s9 = smov 4  }
  0x74   : > { %s1869_s28 = smov 64   ;;  %s1225_s23 = scalar_lea.hbm %s1817_s7, 1024 }
  0x75   : > { %1058 = dma.hbm_to_vmem [thread:$0]  (!%p1867_p4), %s1814_s4, 256, %s291_s12, [#allocation9], %s1869_s28, %s1869_s28, %s1868_s9  }
  0x76   : > { %p1226_p11 = scmp.ne.s32.totalorder %s1817_s7, %s1225_s23  ;;  %p1232_p7 = scmp.lt.u32.totalorder %s1225_s23, %s1817_s7 }
  0x78   : > { %p1228_p9 = pnand %p1226_p11, %p1866_p8 }
  0x7a   : > { %p1229_p13 = pneg %p1228_p9 }
  0x7c   : > { %p1234_p2 = pnand %p1232_p7, %p1229_p13 }
  0x7e   : > { %1237 = shalt.err (!%p1234_p2)
}
  0x7f   : > { %s1238_s8 = scalar_lea.vmem %s310_s1, 1024  ;;  %p1246_p1 = scmp.lt.s32.totalorder %s310_s1, %s310_s1 }
  0x80   : > { %p1239_p3 = scmp.ne.s32.totalorder %s310_s1, %s1238_s8  ;;  %p1247_p6 = scmp.lt.s32.totalorder %s1238_s8, %s1238_s8 }
  0x82   : > { %p1241_p5 = pnand %p1239_p3, %p1866_p8  ;;  %p1248_p10 = por %p1247_p6, %p1246_p1 }
  0x84   : > { %p1242_p12 = pneg %p1241_p5 }
  0x86   : > { %p1249_p0 = pnand %p1248_p10, %p1242_p12 }
  0x88   : > { %1252 = shalt.err (!%p1249_p0)
}
  0x89   : > { %1061 = dma.hbm_to_vmem [thread:$0]  (!%p1867_p4), %s1817_s7, 1024, %s310_s1, [#allocation12], %s1869_s28, %s1869_s28, %s1868_s9  }
  0x8a   : > { %s1658_s25 = scalar_lea.hbm %s1810_s0, %s1562_s21  ;;  %s330_s20 = scalar_lea.vmem [#allocation2], %s1566_s16 }
  0x8b   : > { %s337_s23 = sshll.u32 %s330_s20, 4  ;;  %s1667_s30 = scalar_lea.hbm %s1812_s2, %s1562_s21  ;;  %s1661_s23 = int_to_ptr.vmem [resolvable:$true] %s337_s23 }
  0x8c   : > { %s1870_s26 = sand.u32 1, %s1387_s11   ;;  %s1253_s9 = scalar_lea.hbm %s1658_s25, 128 }
  0x8d   : > { %s327_s1 = scalar_lea.sflag [#allocation3], %s1870_s26  ;;  %p1254_p0 = scmp.ne.s32.totalorder %s1658_s25, %s1253_s9 }
  0x8e   : > { %p1871_p8 = scmp.ne.s32.totalorder %s1865_s14, 0  ;;  %s1258_s12 = scalar_lea.hbm %s1810_s0, 256 }
  0x8f   : > { %p1259_p9 = scmp.lt.u32.totalorder %s1658_s25, %s1810_s0  ;;  %p1260_p13 = scmp.lt.u32.totalorder %s1258_s12, %s1253_s9 }
  0x90   : > { %p1256_p4 = pnand %p1254_p0, %p1871_p8  ;;  %p1262_p2 = scmp.lt.u32.totalorder %s1253_s9, %s1658_s25 }
  0x91   : > { %p1261_p7 = por %p1260_p13, %p1259_p9 }
  0x92   : > { %p1257_p11 = pneg %p1256_p4 }
  0x93   : > { %p1263_p3 = por %p1262_p2, %p1261_p7 }
  0x95   : > { %p1264_p5 = pnand %p1263_p3, %p1257_p11 }
  0x97   : > { %1267 = shalt.err (!%p1264_p5)
}
  0x98   : > { %s1268_s21 = scalar_lea.vmem %s1661_s23, 128  ;;  %s1399_s3 = smov [#allocation2]  }
  0x99   : > { %p1269_p12 = scmp.ne.s32.totalorder %s1661_s23, %s1268_s21  ;;  %s1273_s20 = sshll.u32 %s1399_s3, 4  ;;  %s1274_s20 = int_to_ptr.vmem [resolvable:$false] %s1273_s20 }
  0x9a   : > { %s1275_s27 = scalar_lea.vmem %s1274_s20, 256  ;;  %p1276_p10 = scmp.lt.s32.totalorder %s1661_s23, %s1274_s20 }
  0x9b   : > { %p1271_p1 = pnand %p1269_p12, %p1871_p8  ;;  %p1277_p0 = scmp.lt.s32.totalorder %s1275_s27, %s1268_s21 }
  0x9d   : > { %p1272_p6 = pneg %p1271_p1  ;;  %p1278_p4 = por %p1277_p0, %p1276_p10 }
  0x9f   : > { %p1279_p9 = pnand %p1278_p4, %p1272_p6 }
  0xa1   : > { %1282 = shalt.err (!%p1279_p9)
}
  0xa2   : > { %p1872_p11 = scmp.ne.s32.totalorder %s1863_s19, 0  ;;  %s366_s22 = scalar_lea.vmem [#allocation7], %s1566_s16 }
  0xa3   : > { %s373_s26 = sshll.u32 %s366_s22, 4  ;;  %s1283_s9 = scalar_lea.hbm %s1667_s30, 128  ;;  %s374_s26 = int_to_ptr.vmem [resolvable:$true] %s373_s26 }
  0xa4   : > { %1065 = dma.hbm_to_vmem [thread:$0]  (!%p1872_p11), %s1658_s25, 128, %s1661_s23, %s327_s1  }
  0xa5   : > { %p1284_p13 = scmp.ne.s32.totalorder %s1667_s30, %s1283_s9  ;;  %s1288_s12 = scalar_lea.hbm %s1812_s2, 256 }
  0xa6   : > { %p1289_p3 = scmp.lt.u32.totalorder %s1667_s30, %s1812_s2  ;;  %p1290_p5 = scmp.lt.u32.totalorder %s1288_s12, %s1283_s9 }
  0xa7   : > { %p1286_p7 = pnand %p1284_p13, %p1871_p8  ;;  %p1292_p1 = scmp.lt.u32.totalorder %s1283_s9, %s1667_s30 }
  0xa8   : > { %p1291_p12 = por %p1290_p5, %p1289_p3 }
  0xa9   : > { %p1287_p2 = pneg %p1286_p7 }
  0xaa   : > { %p1293_p6 = por %p1292_p1, %p1291_p12 }
  0xac   : > { %p1294_p10 = pnand %p1293_p6, %p1287_p2 }
  0xae   : > { %1297 = shalt.err (!%p1294_p10)
}
  0xaf   : > { %s1298_s16 = scalar_lea.vmem %s374_s26, 128  ;;  %s1400_s25 = smov [#allocation7]  }
  0xb0   : > { %p1299_p0 = scmp.ne.s32.totalorder %s374_s26, %s1298_s16  ;;  %s1303_s23 = sshll.u32 %s1400_s25, 4  ;;  %s1304_s23 = int_to_ptr.vmem [resolvable:$false] %s1303_s23 }
  0xb1   : > { %s1305_s1 = scalar_lea.vmem %s1304_s23, 256  ;;  %p1306_p13 = scmp.lt.s32.totalorder %s374_s26, %s1304_s23 }
  0xb2   : > { %p1301_p4 = pnand %p1299_p0, %p1871_p8  ;;  %p1307_p7 = scmp.lt.s32.totalorder %s1305_s1, %s1298_s16 }
  0xb4   : > { %p1302_p9 = pneg %p1301_p4  ;;  %p1308_p11 = por %p1307_p7, %p1306_p13 }
  0xb6   : > { %p1309_p3 = pnand %p1308_p11, %p1302_p9 }
  0xb8   : > { %1312 = shalt.err (!%p1309_p3)
}
  0xb9   : > { %p1873_p5 = scmp.ne.s32.totalorder %s1863_s19, 0  ;;  %p1874_p2 = scmp.ne.s32.totalorder %s1854_s17, 0 }
  0xba   : > { %s1714_s14 = sand.u32 (!%p1874_p2), 1, %s1383_s10   ;;  %p1875_p8 = scmp.ne.s32.totalorder (!%p1874_p2), %s1851_s15, 0 }
  0xbb   : > { %1071 = dma.hbm_to_vmem [thread:$0]  (!%p1873_p5), %s1667_s30, 128, %s374_s26, %s1582_s24  }
  0xbc   : > { %382 = sbr.rel (%p1874_p2) target bundleno = 689 (0x2b1), region = 56  ;;  %s1717_s21 = sshll.u32 (!%p1874_p2), %s1714_s14, 3 }
  0xbd   : > { %s385_s3 = scalar_lea.sflag (!%p1874_p2), [#allocation3], %s1714_s14  ;;  %s388_s20 = scalar_lea.vmem (!%p1874_p2), [#allocation2], %s1717_s21 }
  0xc3   : > { %1358 = dma.done.wait (%p1875_p8), %s385_s3, 128  }
  0xc4   : > { %1360 = vsyncadd (%p1875_p8), %s385_s3, 4294967168  ;;  %s393_s17 = sand.u32 1, %s1475_s13   ;;  %s397_s19 = scalar_lea.vmem [#allocation5], %s1717_s21 }
  0xc5   : > { %s394_s24 = scalar_lea.sflag [#allocation6], %s393_s17 }
  0xc6   : > { %1362 = dma.done.wait (%p1875_p8), %s394_s24, 256  }
  0xc7   : > { %1364 = vsyncadd (%p1875_p8), %s394_s24, 4294967040  ;;  %s406_s30 = scalar_lea.vmem [#allocation7], %s1717_s21  ;;  %p1876_p11 = scmp.eq.s32.totalorder %s1475_s13, 0 }
  0xc9   : > { %1366 = dma.done.wait (%p1876_p11), [#allocation9], 512   ;;  %p1877_p12 = pmov %p1876_p11 }
  0xca   : > { %p1878_p1 = pmov %p1876_p11 }
  0xcb   : > { %1368 = vsyncadd (%p1877_p12), [#allocation9], 4294966784 }
  0xcc   : > { %1370 = dma.done.wait (%p1878_p1), [#allocation12], 1024   ;;  %p1879_p6 = pmov %p1878_p1 }
  0xcd   : > { %v1401_v0 = vmov 0.0   ;;  %vm1402_vm0 = vmmov 0   ;;  %v1123_v1 = vld [vmem:[#allocation10] sm:$0xff]   ;;  %v1124_v2 = vld [vmem:[#allocation10 + $0x8] sm:$0xff]   ;;  %v470_v3 = vld [vmem:[%s397_s19] sm:$0xff]  ;;  %vm488_vm1 = vcmask 261120  }
  0xce   : > { %1372 = vsyncadd (%p1879_p6), [#allocation12], 4294966272  ;;  %988 = vmatprep.subr.bf16.mxu0 %v1401_v0  ;;  %992 = vmatprep.mubr.msk.bf16.mxu0 %vm1402_vm0, %v1401_v0  ;;  %v471_v4 = vpack.c.bf16 %v470_v3, %v470_v3  ;;  %v1125_v5 = vld [vmem:[#allocation8] sm:$0xff]   ;;  %v1126_v6 = vld [vmem:[#allocation8 + $0x8] sm:$0xff]   ;;  %s1880_s18 = sld [smem:[#allocation27_spill]]  ;;  %s1881_s29 = sld [smem:[#allocation24_spill]] }
  0xcf   : > { %1012 = vmatprep.subr.bf16.mxu1 %v1401_v0  ;;  %1028 = vmatprep.mubr.msk.bf16.mxu1 %vm1402_vm0, %v1401_v0  ;;  %v464_v7 = vld [vmem:[%s388_s20] sm:$0xff]  ;;  %v1129_v13 = vld [vmem:[#allocation11] sm:$0xff]   ;;  %v1130_v14 = vld [vmem:[#allocation11 + $0x8] sm:$0xff]   ;;  %s967_s16 = sshll.u32 %s1475_s13, 7  ;;  %s462_s25 = scalar_lea.vmem [#allocation13], %s1717_s21 }
  0xd0   : > { %989 = vmatpush3.bf16.msra.mxu0 %v1123_v1  ;;  %v465_v8 = vpack.c.bf16 %v464_v7, %v464_v7  ;;  %v1127_v9 = vld [vmem:[%s1815_s5] sm:$0xff]   ;;  %v1128_v10 = vld [vmem:[%s1815_s5 + $0x8] sm:$0xff]   ;;  %1013 = vmatpush3.bf16.msra.mxu1 %v1129_v13  ;;  %v1133_v17 = vld [vmem:[#allocation11 + $0x20] sm:$0xff]   ;;  %s785_s23 = sshll.u32 %s462_s25, 4  ;;  %s1882_s20 = sld [smem:[#allocation28_spill]]  ;;  %s1768_s23 = int_to_ptr.vmem [resolvable:$true] %s785_s23 }
  0xd1   : > { %990 = vmatprep.subr.bf16.mxu0 %v1401_v0  ;;  %v587_v11 = vld [vmem:[%s406_s30] sm:$0xff]  ;;  %1014 = vmatprep.subr.bf16.mxu1 %v1401_v0  ;;  %v1134_v18 = vld [vmem:[#allocation11 + $0x28] sm:$0xff]   ;;  %s772_s24 = scalar_lea.sflag [#allocation4], %s1714_s14  ;;  %s1313_s13 = scalar_lea.vmem %s1768_s23, 128 }
  0xd2   : > { %v588_v12 = vpack.c.bf16 %v587_v11, %v587_v11  ;;  %v1131_v15 = vld [vmem:[#allocation11 + $0x10] sm:$0xff]   ;;  %v1132_v16 = vld [vmem:[#allocation11 + $0x18] sm:$0xff]   ;;  %p1314_p10 = scmp.ne.s32.totalorder %s1768_s23, %s1313_s13  ;;  %s1403_s21 = smov [#allocation13]  }
  0xd3   : > { %v1135_v19 = vld [vmem:[#allocation11 + $0x30] sm:$0xff]   ;;  %v1136_v20 = vld [vmem:[#allocation11 + $0x38] sm:$0xff]   ;;  %s1317_s19 = sshll.u32 %s1403_s21, 4  ;;  %s1318_s19 = int_to_ptr.vmem [resolvable:$false] %s1317_s19 }
  0xd4   : > { %991 = vmatpush3.bf16.msra.mxu0 %v1124_v2  ;;  %1015 = vmatpush3.bf16.msra.mxu1 %v1130_v14  ;;  %v956_v31 = vld [vmem:[%s1816_s6] ss:$0 sm:$0xff]  ;;  %p1883_p0 = scmp.ne.s32.totalorder %s1881_s29, 0  ;;  %s1319_s30 = scalar_lea.vmem %s1318_s19, 256 }
  0xd5   : > { %996 = vmatprep.subr.bf16.mxu0 %v1401_v0  ;;  %1016 = vmatprep.subr.bf16.mxu1 %v1401_v0  ;;  %v957_v39 = vld [vmem:[%s1880_s18] ss:$0 sm:$0xff]  ;;  %p1320_p13 = scmp.lt.s32.totalorder %s1768_s23, %s1318_s19  ;;  %p1321_p7 = scmp.lt.s32.totalorder %s1319_s30, %s1313_s13 }
  0xd6   : > { %s1766_s17 = scalar_lea.hbm %s1882_s20, %s967_s16  ;;  %p1315_p4 = pnand %p1314_p10, %p1883_p0 }
  0xd7   : > { %993 = vmatmul.mubr.msk.bf16.vlgmr.msra.gmra.mrb[0].mxu0 %vm488_vm1, %v471_v4  ;;  %p1322_p3 = por %p1321_p7, %p1320_p13 }
  0xd8   : > { %997 = vmatpush3.bf16.msra.mxu0 %v1125_v5  ;;  %1000 = vmatprep.mubr.msk.bf16.mxu0 %vm1402_vm0, %v1401_v0  ;;  %p1316_p9 = pneg %p1315_p4 }
  0xd9   : > { %998 = vmatprep.subr.bf16.mxu0 %v1401_v0  ;;  %1017 = vmatpush3.bf16.msra.mxu1 %v1131_v15 }
  0xda   : > { %1018 = vmatprep.subr.bf16.mxu1 %v1401_v0  ;;  %p1323_p5 = pnand %p1322_p3, %p1316_p9 }
  0xdc   : > { %999 = vmatpush3.bf16.msra.mxu0 %v1126_v6 }
  0xdd   : > { %1004 = vmatprep.subr.bf16.mxu0 %v1401_v0  ;;  %1019 = vmatpush3.bf16.msra.mxu1 %v1132_v16 }
  0xde   : > { %1020 = vmatprep.subr.bf16.mxu1 %v1401_v0 }
  0xdf   : > { %1001 = vmatmul.mubr.msk.bf16.vlgmr.msra.gmra.mrb[4].mxu0 %vm488_vm1, %v465_v8 }
  0xe0   : > { %1005 = vmatpush3.bf16.msra.mxu0 %v1127_v9  ;;  %1008 = vmatprep.mubr.msk.bf16.mxu0 %vm1402_vm0, %v1401_v0 }
  0xe1   : > { %1006 = vmatprep.subr.bf16.mxu0 %v1401_v0  ;;  %1021 = vmatpush3.bf16.msra.mxu1 %v1133_v17 }
  0xe2   : > { %1022 = vmatprep.subr.bf16.mxu1 %v1401_v0 }
  0xe4   : > { %1007 = vmatpush3.bf16.msra.mxu0 %v1128_v10 }
  0xe5   : > { %1023 = vmatpush3.bf16.msra.mxu1 %v1134_v18 }
  0xe6   : > { %1024 = vmatprep.subr.bf16.mxu1 %v1401_v0 }
  0xe7   : > { %1009 = vmatmul.mubr.msk.bf16.vlgmr.msra.gmra.mrb[8].mxu0 %vm488_vm1, %v588_v12 }
  0xe9   : > { %1025 = vmatpush3.bf16.msra.mxu1 %v1135_v19 }
  0xea   : > { %1026 = vmatprep.subr.bf16.mxu1 %v1401_v0 }
  0xed   : > { %1027 = vmatpush3.bf16.msra.mxu1 %v1136_v20 }
 0x1aa   : > { %v526_v21 = vpop.f32.mrb[0].mxu0 }
 0x1ab   : > { %v994_v22 = vpop.f32.mrb[1].mxu0 }
 0x1ac   : > { %v529_v23 = vpop.f32.mrb[2].mxu0 }
 0x1ad   : > { %v995_v24 = vpop.f32.mrb[3].mxu0 }
 0x1b2   : > { %v581_v25 = vpop.f32.mrb[4].mxu0 }
 0x1b3   : > { %v582_v26 = vadd.f32 %v581_v25, %v526_v21  ;;  %v1002_v27 = vpop.f32.mrb[5].mxu0 }
 0x1b4   : > { %v584_v28 = vpop.f32.mrb[6].mxu0 }
 0x1b5   : > { %v1003_v29 = vpop.f32.mrb[7].mxu0 }
 0x1ba   : > { %v642_v30 = vpop.f32.mrb[8].mxu0 }
 0x1bb   : > { %v648_v32 = vadd.f32 %v642_v30, %v582_v26  ;;  %v1010_v33 = vpop.f32.mrb[9].mxu0 }
 0x1bc   : > { %v645_v34 = vpop.f32.mrb[10].mxu0 }
 0x1bd   : > { %v656_v35 = vadd.f32 %v956_v31, %v648_v32  ;;  %v1011_v36 = vpop.f32.mrb[11].mxu0 }
 0x1bf   : > { %v657_v37 = vpack.c.bf16 %v656_v35, %v656_v35 }
 0x1c1   : > { %1137 = vtanh.bf16 %v657_v37 }
 0x1cc   : > { %v1138_v38 = vpop.eup %1137 }
 0x1cd   : > { %1029 = vmatmul.mubr.bf16.vlgmr.msra.gmra.mrb[0].mxu1 %v1138_v38 }
 0x2a0   : > { %v764_v40 = vpop.f32.mrb[0].mxu1 }
 0x2a1   : > { %v765_v41 = vadd.f32 %v957_v39, %v764_v40  ;;  %v1030_v42 = vpop.f32.mrb[1].mxu1 }
 0x2a2   : > { %v767_v43 = vpop.f32.mrb[2].mxu1 }
 0x2a3   : > { %770 = vst [vmem:[%s462_s25] sm:$0xff] %v765_v41  ;;  %v1031_v44 = vpop.f32.mrb[3].mxu1 }
 0x2a4   : > { %1326 = shalt.err (!%p1323_p5)
}
 0x2a5   : > { %s1327_s14 = scalar_lea.hbm %s1766_s17, 128  ;;  %s1331_s22 = scalar_lea.hbm %s1882_s20, 256 }
 0x2a6   : > { %p1328_p2 = scmp.ne.s32.totalorder %s1766_s17, %s1327_s14  ;;  %p1332_p12 = scmp.lt.u32.totalorder %s1766_s17, %s1882_s20 }
 0x2a7   : > { %p1333_p1 = scmp.lt.u32.totalorder %s1331_s22, %s1327_s14  ;;  %p1335_p10 = scmp.lt.u32.totalorder %s1327_s14, %s1766_s17 }
 0x2a8   : > { %p1329_p8 = pnand %p1328_p2, %p1883_p0 }
 0x2a9   : > { %p1334_p6 = por %p1333_p1, %p1332_p12 }
 0x2aa   : > { %p1330_p11 = pneg %p1329_p8 }
 0x2ab   : > { %p1336_p4 = por %p1335_p10, %p1334_p6 }
 0x2ad   : > { %p1337_p9 = pnand %p1336_p4, %p1330_p11 }
 0x2af   : > { %1340 = shalt.err (!%p1337_p9)
}
 0x2b0   : > { %1050 = dma.vmem_to_hbm [thread:$0]  (%p1883_p0), %s1768_s23, 128, %s1766_s17, %s772_s24  }
 0x2b1 PF: > { %s1884_s28 = sld [smem:[#allocation19_spill]]  ;;  %s1885_s8 = sld [smem:[#allocation21_spill]] }
 0x2b2   : > { %s1886_s12 = sld [smem:[#allocation20_spill]] }
 0x2b7   : > { %s797_s18 = sand.u32 1, %s1884_s28   ;;  %p1887_p13 = scmp.ne.s32.totalorder %s1885_s8, 0 }
 0x2b8   : > { %p1888_p7 = scmp.ge.s32.totalorder %s1886_s12, 2  ;;  %s798_s16 = scalar_lea.sflag [#allocation4], %s797_s18 }
 0x2ba   : > { %p1073_p3 = pnand %p1888_p7, %p1887_p13 }
 0x2bc   : > { %1374 = dma.done.wait (!%p1073_p3), %s798_s16, 128  }
 0x2bd   : > { %1376 = vsyncadd (!%p1073_p3), %s798_s16, 4294967168  ;;  %s1889_s12 = sld [smem:[#allocation22_spill]]  ;;  %s1890_s25 = sld [smem:[#allocation23_spill]] }
 0x2be   : > { %s1891_s30 = smov %s1383_s10  ;;  %s1892_s10 = smov %s1387_s11 }
 0x2c3   : > { %p27_p5 = scmp.ge.s32.totalorder %s1889_s12, 4   ;;  %s1893_s11 = smov %s1890_s25 }
 0x2c5   :  { %29 = sbr.rel (!%p27_p5) target bundleno = 14 (0xe), region = 137 }
 0x2cc   :  { %803 = vsyncpa [#allocation3], 1 }
 0x2cd   :  { %805 = vsyncpa [#allocation3 + $0x1], 1 }
 0x2ce   :  { %806 = vsyncpa [#allocation6], 1 }
 0x2cf   :  { %808 = vsyncpa [#allocation6 + $0x1], 1 }
 0x2d0   :  { %809 = vsyncpa [#allocation9], 1 }
 0x2d1   :  { %810 = vsyncpa [#allocation12], 1 }
 0x2d2   :  { %811 = vsyncpa [#allocation4], 1 }
 0x2d3   :  { %813 = vsyncpa [#allocation4 + $0x1], 1 }

// kernel: tpu_custom_call.1
= control target key start
LH: loop header
LB: loop body
LE: loop exit
PB: predicated region body
PF: predicated region fallthrough
CT: control target
= control target key end

     0   :  { %s1810_s0 = inlined_call_operand.hbm [shape: f32[16,32], index: 0, kind: input, shape index: {}]   ;;  %s1811_s1 = inlined_call_operand.hbm [shape: f32[16,32], index: 1, kind: input, shape index: {}]   ;;  %s1812_s2 = inlined_call_operand.hbm [shape: f32[16,32], index: 2, kind: input, shape index: {}]   ;;  %s1813_s3 = inlined_call_operand.hbm [shape: bf16[32,128], index: 3, kind: input, shape index: {}]   ;;  %s1814_s4 = inlined_call_operand.hbm [shape: bf16[32,128], index: 4, kind: input, shape index: {}]   ;;  %s1815_s5 = inlined_call_operand.vmem [shape: bf16[32,128], index: 5, kind: input, shape index: {}]   ;;  %s1816_s6 = inlined_call_operand.vmem [shape: f32[1,128], index: 6, kind: input, shape index: {}]   ;;  %s1817_s7 = inlined_call_operand.hbm [shape: bf16[128,128], index: 7, kind: input, shape index: {}]   ;;  %s1818_s8 = inlined_call_operand.vmem [shape: f32[1,128], index: 8, kind: input, shape index: {}]   ;;  %s1819_s9 = inlined_call_operand.hbm [shape: f32[16,128], index: 9, kind: output, shape index: {}]  }
   0x1   :  { %1845 = sst [smem:[#allocation25_spill]] %s1811_s1 }
   0x2   :  { %1846 = sst [smem:[#allocation26_spill]] %s1813_s3 }
   0x3   :  { %1847 = sst [smem:[#allocation27_spill]] %s1818_s8 }
   0x4   :  { %1848 = sst [smem:[#allocation28_spill]] %s1819_s9 }
   0x5   :  { %14 = vsyncpa [#allocation3], 0 }
   0x6   :  { %16 = vsyncpa [#allocation3 + $0x1], 0 }
   0x7   :  { %17 = vsyncpa [#allocation6], 0 }
   0x8   :  { %19 = vsyncpa [#allocation6 + $0x1], 0 }
   0x9   :  { %20 = vsyncpa [#allocation9], 0 }
   0xa   :  { %21 = vsyncpa [#allocation12], 0 }
   0xb   :  { %22 = vsyncpa [#allocation4], 0 }
   0xc   :  { %24 = vsyncpa [#allocation4 + $0x1], 0  ;;  %s1454_s30 = smov 0   ;;  %s1456_s10 = smov 0  }
   0xd   :  { %s1458_s11 = smov 0   ;;  %s1460_s12 = smov 0  }
   0xe LB: > { %1849 = sst [smem:[#allocation19_spill]] %s1379_s30  ;;  %s1475_s13 = sadd.s32 4294967295, %s1391_s12   ;;  %s1391_s12 = sphi %s1460_s12, %s1889_s12   ;;  %s1387_s11 = sphi %s1458_s11, %s1893_s11   ;;  %s1383_s10 = sphi %s1456_s10, %s1892_s10   ;;  %s1379_s30 = sphi %s1454_s30, %s1891_s30  }
   0xf   : > { %1850 = sst [smem:[#allocation20_spill]] %s1391_s12  ;;  %s927_s14 = sadd.s32 4294967294, %s1391_s12  }
  0x10   : > { %p50_p0 = scmp.ne.s32.totalorder %s1383_s10, %s1379_s30  ;;  %p1820_p1 = scmp.eq.s32.totalorder %s1475_s13, 0 }
  0x11   : > { %p258_p3 = scmp.eq.s32.totalorder %s927_s14, 1  ;;  %p928_p5 = scmp.ge.s32.totalorder %s1391_s12, 1 }
  0x12   : > { %p1484_p4 = por %p1820_p1, %p50_p0  ;;  %p265_p7 = scmp.lt.s32.totalorder %s1391_s12, 3 }
  0x13   : > { %p1489_p6 = por %p258_p3, %p50_p0  ;;  %s1393_s18 = smov [#allocation8]  }
  0x14   : > { %s1851_s15 = scalar_select %p1484_p4, 1, 0 }
  0x15   : > { %s1852_s16 = scalar_select %p1489_p6, 1, 0 }
  0x16   : > { %p1494_p8 = pnand %p928_p5, %p265_p7  ;;  %s277_s19 = sshll.u32 %s1393_s18, 4  ;;  %s1498_s19 = int_to_ptr.vmem [resolvable:$true] %s277_s19 }
  0x17   : > { %1853 = sst [smem:[#allocation21_spill]] %s1852_s16  ;;  %s1510_s21 = sadd.s32 1, %s1391_s12  }
  0x18   : > { %s1854_s17 = scalar_select %p1494_p8, 1, 0 }
  0x19   : > { %p1052_p9 = pneg %p1494_p8  ;;  %1856 = sst [smem:[#allocation22_spill]] %s1510_s21 }
  0x1a   : > { %s37_s22 = sadd.s32 1, %s1387_s11  ;;  %s34_s23 = ssub.s32 %s1391_s12, %s1510_s21 }
  0x1b   : > { %p1505_p11 = pnand %p1052_p9, %p1820_p1  ;;  %s1857_s3 = sld [smem:[#allocation26_spill]] }
  0x1d   : > { %s1855_s20 = scalar_select %p1505_p11, 1, 0 }
  0x1e   : > { %p1523_p13 = pneg %p1505_p11 }
  0x20   : > { %s1858_s29 = scalar_select %p1523_p13, 1, 0 }
  0x21   : > { %s1139_s26 = scalar_lea.hbm %s1857_s3, 256 }
  0x22   : > { %p1140_p12 = scmp.ne.s32.totalorder %s1857_s3, %s1139_s26  ;;  %p1146_p5 = scmp.lt.u32.totalorder %s1139_s26, %s1857_s3 }
  0x24   : > { %p1142_p0 = pnand %p1523_p13, %p1140_p12 }
  0x26   : > { %p1143_p3 = pneg %p1142_p0 }
  0x28   : > { %p1148_p7 = pnand %p1146_p5, %p1143_p3 }
  0x2a   : > { %1151 = shalt.err (!%p1148_p7)
}
  0x2b   : > { %s1152_s24 = scalar_lea.vmem %s1498_s19, 256  ;;  %p1160_p2 = scmp.lt.s32.totalorder %s1498_s19, %s1498_s19 }
  0x2c   : > { %p1153_p9 = scmp.ne.s32.totalorder %s1498_s19, %s1152_s24  ;;  %p1161_p6 = scmp.lt.s32.totalorder %s1152_s24, %s1152_s24 }
  0x2e   : > { %p1155_p10 = pnand %p1153_p9, %p1523_p13  ;;  %p1162_p12 = por %p1161_p6, %p1160_p2 }
  0x30   : > { %p1156_p1 = pneg %p1155_p10 }
  0x32   : > { %p1163_p0 = pnand %p1162_p12, %p1156_p1 }
  0x34   : > { %1166 = shalt.err (!%p1163_p0)
}
  0x35   : > { %s1824_s25 = smov 64   ;;  %s1826_s26 = smov 4  }
  0x36   : > { %1055 = dma.hbm_to_vmem [thread:$0]  (!%p1505_p11), %s1857_s3, 256, %s1498_s19, [#allocation9], %s1824_s25, %s1824_s25, %s1826_s26  }
  0x37   : > { %p35_p1 = scmp.eq.s32.totalorder %s34_s23, 0  ;;  %p44_p2 = scmp.ne.s32.totalorder %s1387_s11, %s1383_s10 }
  0x38   : > { %p45_p6 = scmp.eq.s32.totalorder %s1391_s12, 0  ;;  %p1079_p10 = scmp.lt.s32.totalorder %s1391_s12, 2 }
  0x39   : > { %s1552_s14 = scalar_select %p35_p1, %s1387_s11, %s37_s22  }
  0x3a   : > { %p46_p3 = por %p45_p6, %p44_p2  ;;  %p1860_p5 = scmp.eq.s32.totalorder %s1475_s13, 1 }
  0x3b   : > { %1859 = sst [smem:[#allocation23_spill]] %s1552_s14  ;;  %s1828_s24 = sand.u32 1, %s1387_s11  }
  0x3c   : > { %p1556_p7 = por %p1860_p5, %p44_p2  ;;  %s1562_s21 = sshll.u32 %s1391_s12, 7 }
  0x3d   : > { %s1566_s16 = sshll.u32 %s1828_s24, 3  ;;  %p1568_p9 = pnand %p1079_p10, %p46_p3 }
  0x3e   : > { %s1861_s18 = scalar_select %p1556_p7, 1, 0 }
  0x3f   : > { %s1863_s19 = scalar_select %p1568_p9, 1, 0 }
  0x40   : > { %1862 = sst [smem:[#allocation24_spill]] %s1861_s18  ;;  %s344_s22 = sand.u32 1, %s1391_s12  }
  0x41   : > { %s1864_s1 = sld [smem:[#allocation25_spill]]  ;;  %s348_s25 = scalar_lea.vmem [#allocation5], %s1566_s16 }
  0x42   : > { %s355_s26 = sshll.u32 %s348_s25, 4  ;;  %s1582_s24 = scalar_lea.sflag [#allocation6], %s344_s22  ;;  %s1580_s26 = int_to_ptr.vmem [resolvable:$true] %s355_s26 }
  0x43   : > { %p1588_p0 = pneg %p1568_p9 }
  0x45   : > { %s1865_s14 = scalar_select %p1588_p0, 1, 0 }
  0x47   : > { %s1577_s28 = scalar_lea.hbm %s1864_s1, %s1562_s21  ;;  %s1172_s12 = scalar_lea.hbm %s1864_s1, 256 }
  0x48   : > { %s1167_s3 = scalar_lea.hbm %s1577_s28, 128  ;;  %p1173_p6 = scmp.lt.u32.totalorder %s1577_s28, %s1864_s1 }
  0x49   : > { %p1168_p12 = scmp.ne.s32.totalorder %s1577_s28, %s1167_s3  ;;  %p1174_p10 = scmp.lt.u32.totalorder %s1172_s12, %s1167_s3 }
  0x4a   : > { %p1176_p5 = scmp.lt.u32.totalorder %s1167_s3, %s1577_s28 }
  0x4b   : > { %p1170_p1 = pnand %p1588_p0, %p1168_p12  ;;  %p1175_p3 = por %p1174_p10, %p1173_p6 }
  0x4d   : > { %p1171_p2 = pneg %p1170_p1  ;;  %p1177_p7 = por %p1176_p5, %p1175_p3 }
  0x4f   : > { %p1178_p4 = pnand %p1177_p7, %p1171_p2 }
  0x51   : > { %1181 = shalt.err (!%p1178_p4)
}
  0x52   : > { %s1182_s22 = scalar_lea.vmem %s1580_s26, 128  ;;  %s1396_s23 = smov [#allocation5]  }
  0x53   : > { %p1183_p12 = scmp.ne.s32.totalorder %s1580_s26, %s1182_s22  ;;  %s1187_s27 = sshll.u32 %s1396_s23, 4  ;;  %s1188_s27 = int_to_ptr.vmem [resolvable:$false] %s1187_s27 }
  0x54   : > { %s1189_s30 = scalar_lea.vmem %s1188_s27, 256  ;;  %p1190_p11 = scmp.lt.s32.totalorder %s1580_s26, %s1188_s27 }
  0x55   : > { %p1185_p1 = pnand %p1183_p12, %p1588_p0  ;;  %p1191_p13 = scmp.lt.s32.totalorder %s1189_s30, %s1182_s22 }
  0x57   : > { %p1186_p8 = pneg %p1185_p1  ;;  %p1192_p6 = por %p1191_p13, %p1190_p11 }
  0x59   : > { %p1193_p10 = pnand %p1192_p6, %p1186_p8 }
  0x5b   : > { %1196 = shalt.err (!%p1193_p10)
}
  0x5c   : > { %1068 = dma.hbm_to_vmem [thread:$0]  (!%p1568_p9), %s1577_s28, 128, %s1580_s26, %s1582_s24  }
  0x5d   : > { %s1397_s3 = smov [#allocation10]   ;;  %s1398_s25 = smov [#allocation11]  }
  0x5e   : > { %s290_s12 = sshll.u32 %s1397_s3, 4  ;;  %s309_s1 = sshll.u32 %s1398_s25, 4  ;;  %s291_s12 = int_to_ptr.vmem [resolvable:$true] %s290_s12  ;;  %s310_s1 = int_to_ptr.vmem [resolvable:$true] %s309_s1 }
  0x5f   : > { %s1197_s27 = scalar_lea.hbm %s1814_s4, 256  ;;  %p1866_p8 = scmp.ne.s32.totalorder %s1858_s29, 0 }
  0x60   : > { %p1198_p4 = scmp.ne.s32.totalorder %s1814_s4, %s1197_s27  ;;  %p1204_p7 = scmp.lt.u32.totalorder %s1197_s27, %s1814_s4 }
  0x62   : > { %p1200_p11 = pnand %p1198_p4, %p1866_p8 }
  0x64   : > { %p1201_p13 = pneg %p1200_p11 }
  0x66   : > { %p1206_p2 = pnand %p1204_p7, %p1201_p13 }
  0x68   : > { %1209 = shalt.err (!%p1206_p2)
}
  0x69   : > { %s1210_s26 = scalar_lea.vmem %s291_s12, 256  ;;  %p1218_p1 = scmp.lt.s32.totalorder %s291_s12, %s291_s12 }
  0x6a   : > { %p1211_p3 = scmp.ne.s32.totalorder %s291_s12, %s1210_s26  ;;  %p1219_p6 = scmp.lt.s32.totalorder %s1210_s26, %s1210_s26 }
  0x6c   : > { %p1213_p5 = pnand %p1211_p3, %p1866_p8  ;;  %p1220_p10 = por %p1219_p6, %p1218_p1 }
  0x6e   : > { %p1214_p12 = pneg %p1213_p5 }
  0x70   : > { %p1221_p9 = pnand %p1220_p10, %p1214_p12 }
  0x72   : > { %1224 = shalt.err (!%p1221_p9)
}
  0x73   : > { %p1867_p4 = scmp.ne.s32.totalorder %s1855_s20, 0  ;;  %s1868_s9 = smov 4  }
  0x74   : > { %s1869_s28 = smov 64   ;;  %s1225_s23 = scalar_lea.hbm %s1817_s7, 1024 }
  0x75   : > { %1058 = dma.hbm_to_vmem [thread:$0]  (!%p1867_p4), %s1814_s4, 256, %s291_s12, [#allocation9], %s1869_s28, %s1869_s28, %s1868_s9  }
  0x76   : > { %p1226_p11 = scmp.ne.s32.totalorder %s1817_s7, %s1225_s23  ;;  %p1232_p7 = scmp.lt.u32.totalorder %s1225_s23, %s1817_s7 }
  0x78   : > { %p1228_p9 = pnand %p1226_p11, %p1866_p8 }
  0x7a   : > { %p1229_p13 = pneg %p1228_p9 }
  0x7c   : > { %p1234_p2 = pnand %p1232_p7, %p1229_p13 }
  0x7e   : > { %1237 = shalt.err (!%p1234_p2)
}
  0x7f   : > { %s1238_s8 = scalar_lea.vmem %s310_s1, 1024  ;;  %p1246_p1 = scmp.lt.s32.totalorder %s310_s1, %s310_s1 }
  0x80   : > { %p1239_p3 = scmp.ne.s32.totalorder %s310_s1, %s1238_s8  ;;  %p1247_p6 = scmp.lt.s32.totalorder %s1238_s8, %s1238_s8 }
  0x82   : > { %p1241_p5 = pnand %p1239_p3, %p1866_p8  ;;  %p1248_p10 = por %p1247_p6, %p1246_p1 }
  0x84   : > { %p1242_p12 = pneg %p1241_p5 }
  0x86   : > { %p1249_p0 = pnand %p1248_p10, %p1242_p12 }
  0x88   : > { %1252 = shalt.err (!%p1249_p0)
}
  0x89   : > { %1061 = dma.hbm_to_vmem [thread:$0]  (!%p1867_p4), %s1817_s7, 1024, %s310_s1, [#allocation12], %s1869_s28, %s1869_s28, %s1868_s9  }
  0x8a   : > { %s1658_s25 = scalar_lea.hbm %s1810_s0, %s1562_s21  ;;  %s330_s20 = scalar_lea.vmem [#allocation2], %s1566_s16 }
  0x8b   : > { %s337_s23 = sshll.u32 %s330_s20, 4  ;;  %s1667_s30 = scalar_lea.hbm %s1812_s2, %s1562_s21  ;;  %s1661_s23 = int_to_ptr.vmem [resolvable:$true] %s337_s23 }
  0x8c   : > { %s1870_s26 = sand.u32 1, %s1387_s11   ;;  %s1253_s9 = scalar_lea.hbm %s1658_s25, 128 }
  0x8d   : > { %s327_s1 = scalar_lea.sflag [#allocation3], %s1870_s26  ;;  %p1254_p0 = scmp.ne.s32.totalorder %s1658_s25, %s1253_s9 }
  0x8e   : > { %p1871_p8 = scmp.ne.s32.totalorder %s1865_s14, 0  ;;  %s1258_s12 = scalar_lea.hbm %s1810_s0, 256 }
  0x8f   : > { %p1259_p9 = scmp.lt.u32.totalorder %s1658_s25, %s1810_s0  ;;  %p1260_p13 = scmp.lt.u32.totalorder %s1258_s12, %s1253_s9 }
  0x90   : > { %p1256_p4 = pnand %p1254_p0, %p1871_p8  ;;  %p1262_p2 = scmp.lt.u32.totalorder %s1253_s9, %s1658_s25 }
  0x91   : > { %p1261_p7 = por %p1260_p13, %p1259_p9 }
  0x92   : > { %p1257_p11 = pneg %p1256_p4 }
  0x93   : > { %p1263_p3 = por %p1262_p2, %p1261_p7 }
  0x95   : > { %p1264_p5 = pnand %p1263_p3, %p1257_p11 }
  0x97   : > { %1267 = shalt.err (!%p1264_p5)
}
  0x98   : > { %s1268_s21 = scalar_lea.vmem %s1661_s23, 128  ;;  %s1399_s3 = smov [#allocation2]  }
  0x99   : > { %p1269_p12 = scmp.ne.s32.totalorder %s1661_s23, %s1268_s21  ;;  %s1273_s20 = sshll.u32 %s1399_s3, 4  ;;  %s1274_s20 = int_to_ptr.vmem [resolvable:$false] %s1273_s20 }
  0x9a   : > { %s1275_s27 = scalar_lea.vmem %s1274_s20, 256  ;;  %p1276_p10 = scmp.lt.s32.totalorder %s1661_s23, %s1274_s20 }
  0x9b   : > { %p1271_p1 = pnand %p1269_p12, %p1871_p8  ;;  %p1277_p0 = scmp.lt.s32.totalorder %s1275_s27, %s1268_s21 }
  0x9d   : > { %p1272_p6 = pneg %p1271_p1  ;;  %p1278_p4 = por %p1277_p0, %p1276_p10 }
  0x9f   : > { %p1279_p9 = pnand %p1278_p4, %p1272_p6 }
  0xa1   : > { %1282 = shalt.err (!%p1279_p9)
}
  0xa2   : > { %p1872_p11 = scmp.ne.s32.totalorder %s1863_s19, 0  ;;  %s366_s22 = scalar_lea.vmem [#allocation7], %s1566_s16 }
  0xa3   : > { %s373_s26 = sshll.u32 %s366_s22, 4  ;;  %s1283_s9 = scalar_lea.hbm %s1667_s30, 128  ;;  %s374_s26 = int_to_ptr.vmem [resolvable:$true] %s373_s26 }
  0xa4   : > { %1065 = dma.hbm_to_vmem [thread:$0]  (!%p1872_p11), %s1658_s25, 128, %s1661_s23, %s327_s1  }
  0xa5   : > { %p1284_p13 = scmp.ne.s32.totalorder %s1667_s30, %s1283_s9  ;;  %s1288_s12 = scalar_lea.hbm %s1812_s2, 256 }
  0xa6   : > { %p1289_p3 = scmp.lt.u32.totalorder %s1667_s30, %s1812_s2  ;;  %p1290_p5 = scmp.lt.u32.totalorder %s1288_s12, %s1283_s9 }
  0xa7   : > { %p1286_p7 = pnand %p1284_p13, %p1871_p8  ;;  %p1292_p1 = scmp.lt.u32.totalorder %s1283_s9, %s1667_s30 }
  0xa8   : > { %p1291_p12 = por %p1290_p5, %p1289_p3 }
  0xa9   : > { %p1287_p2 = pneg %p1286_p7 }
  0xaa   : > { %p1293_p6 = por %p1292_p1, %p1291_p12 }
  0xac   : > { %p1294_p10 = pnand %p1293_p6, %p1287_p2 }
  0xae   : > { %1297 = shalt.err (!%p1294_p10)
}
  0xaf   : > { %s1298_s16 = scalar_lea.vmem %s374_s26, 128  ;;  %s1400_s25 = smov [#allocation7]  }
  0xb0   : > { %p1299_p0 = scmp.ne.s32.totalorder %s374_s26, %s1298_s16  ;;  %s1303_s23 = sshll.u32 %s1400_s25, 4  ;;  %s1304_s23 = int_to_ptr.vmem [resolvable:$false] %s1303_s23 }
  0xb1   : > { %s1305_s1 = scalar_lea.vmem %s1304_s23, 256  ;;  %p1306_p13 = scmp.lt.s32.totalorder %s374_s26, %s1304_s23 }
  0xb2   : > { %p1301_p4 = pnand %p1299_p0, %p1871_p8  ;;  %p1307_p7 = scmp.lt.s32.totalorder %s1305_s1, %s1298_s16 }
  0xb4   : > { %p1302_p9 = pneg %p1301_p4  ;;  %p1308_p11 = por %p1307_p7, %p1306_p13 }
  0xb6   : > { %p1309_p3 = pnand %p1308_p11, %p1302_p9 }
  0xb8   : > { %1312 = shalt.err (!%p1309_p3)
}
  0xb9   : > { %p1873_p5 = scmp.ne.s32.totalorder %s1863_s19, 0  ;;  %p1874_p2 = scmp.ne.s32.totalorder %s1854_s17, 0 }
  0xba   : > { %s1714_s14 = sand.u32 (!%p1874_p2), 1, %s1383_s10   ;;  %p1875_p8 = scmp.ne.s32.totalorder (!%p1874_p2), %s1851_s15, 0 }
  0xbb   : > { %1071 = dma.hbm_to_vmem [thread:$0]  (!%p1873_p5), %s1667_s30, 128, %s374_s26, %s1582_s24  }
  0xbc   : > { %382 = sbr.rel (%p1874_p2) target bundleno = 689 (0x2b1), region = 56  ;;  %s1717_s21 = sshll.u32 (!%p1874_p2), %s1714_s14, 3 }
  0xbd   : > { %s385_s3 = scalar_lea.sflag (!%p1874_p2), [#allocation3], %s1714_s14  ;;  %s388_s20 = scalar_lea.vmem (!%p1874_p2), [#allocation2], %s1717_s21 }
  0xc3   : > { %1358 = dma.done.wait (%p1875_p8), %s385_s3, 128  }
  0xc4   : > { %1360 = vsyncadd (%p1875_p8), %s385_s3, 4294967168  ;;  %s393_s17 = sand.u32 1, %s1475_s13   ;;  %s397_s19 = scalar_lea.vmem [#allocation5], %s1717_s21 }
  0xc5   : > { %s394_s24 = scalar_lea.sflag [#allocation6], %s393_s17 }
  0xc6   : > { %1362 = dma.done.wait (%p1875_p8), %s394_s24, 256  }
  0xc7   : > { %1364 = vsyncadd (%p1875_p8), %s394_s24, 4294967040  ;;  %s406_s30 = scalar_lea.vmem [#allocation7], %s1717_s21  ;;  %p1876_p11 = scmp.eq.s32.totalorder %s1475_s13, 0 }
  0xc9   : > { %1366 = dma.done.wait (%p1876_p11), [#allocation9], 512   ;;  %p1877_p12 = pmov %p1876_p11 }
  0xca   : > { %p1878_p1 = pmov %p1876_p11 }
  0xcb   : > { %1368 = vsyncadd (%p1877_p12), [#allocation9], 4294966784 }
  0xcc   : > { %1370 = dma.done.wait (%p1878_p1), [#allocation12], 1024   ;;  %p1879_p6 = pmov %p1878_p1 }
  0xcd   : > { %v1401_v0 = vmov 0.0   ;;  %vm1402_vm0 = vmmov 0   ;;  %v1123_v1 = vld [vmem:[#allocation10] sm:$0xff]   ;;  %v1124_v2 = vld [vmem:[#allocation10 + $0x8] sm:$0xff]   ;;  %v470_v3 = vld [vmem:[%s397_s19] sm:$0xff]  ;;  %vm488_vm1 = vcmask 261120  }
  0xce   : > { %1372 = vsyncadd (%p1879_p6), [#allocation12], 4294966272  ;;  %988 = vmatprep.subr.bf16.mxu0 %v1401_v0  ;;  %992 = vmatprep.mubr.msk.bf16.mxu0 %vm1402_vm0, %v1401_v0  ;;  %v471_v4 = vpack.c.bf16 %v470_v3, %v470_v3  ;;  %v1125_v5 = vld [vmem:[#allocation8] sm:$0xff]   ;;  %v1126_v6 = vld [vmem:[#allocation8 + $0x8] sm:$0xff]   ;;  %s1880_s18 = sld [smem:[#allocation27_spill]]  ;;  %s1881_s29 = sld [smem:[#allocation24_spill]] }
  0xcf   : > { %1012 = vmatprep.subr.bf16.mxu1 %v1401_v0  ;;  %1028 = vmatprep.mubr.msk.bf16.mxu1 %vm1402_vm0, %v1401_v0  ;;  %v464_v7 = vld [vmem:[%s388_s20] sm:$0xff]  ;;  %v1129_v13 = vld [vmem:[#allocation11] sm:$0xff]   ;;  %v1130_v14 = vld [vmem:[#allocation11 + $0x8] sm:$0xff]   ;;  %s967_s16 = sshll.u32 %s1475_s13, 7  ;;  %s462_s25 = scalar_lea.vmem [#allocation13], %s1717_s21 }
  0xd0   : > { %989 = vmatpush3.bf16.msra.mxu0 %v1123_v1  ;;  %v465_v8 = vpack.c.bf16 %v464_v7, %v464_v7  ;;  %v1127_v9 = vld [vmem:[%s1815_s5] sm:$0xff]   ;;  %v1128_v10 = vld [vmem:[%s1815_s5 + $0x8] sm:$0xff]   ;;  %1013 = vmatpush3.bf16.msra.mxu1 %v1129_v13  ;;  %v1133_v17 = vld [vmem:[#allocation11 + $0x20] sm:$0xff]   ;;  %s785_s23 = sshll.u32 %s462_s25, 4  ;;  %s1882_s20 = sld [smem:[#allocation28_spill]]  ;;  %s1768_s23 = int_to_ptr.vmem [resolvable:$true] %s785_s23 }
  0xd1   : > { %990 = vmatprep.subr.bf16.mxu0 %v1401_v0  ;;  %v587_v11 = vld [vmem:[%s406_s30] sm:$0xff]  ;;  %1014 = vmatprep.subr.bf16.mxu1 %v1401_v0  ;;  %v1134_v18 = vld [vmem:[#allocation11 + $0x28] sm:$0xff]   ;;  %s772_s24 = scalar_lea.sflag [#allocation4], %s1714_s14  ;;  %s1313_s13 = scalar_lea.vmem %s1768_s23, 128 }
  0xd2   : > { %v588_v12 = vpack.c.bf16 %v587_v11, %v587_v11  ;;  %v1131_v15 = vld [vmem:[#allocation11 + $0x10] sm:$0xff]   ;;  %v1132_v16 = vld [vmem:[#allocation11 + $0x18] sm:$0xff]   ;;  %p1314_p10 = scmp.ne.s32.totalorder %s1768_s23, %s1313_s13  ;;  %s1403_s21 = smov [#allocation13]  }
  0xd3   : > { %v1135_v19 = vld [vmem:[#allocation11 + $0x30] sm:$0xff]   ;;  %v1136_v20 = vld [vmem:[#allocation11 + $0x38] sm:$0xff]   ;;  %s1317_s19 = sshll.u32 %s1403_s21, 4  ;;  %s1318_s19 = int_to_ptr.vmem [resolvable:$false] %s1317_s19 }
  0xd4   : > { %991 = vmatpush3.bf16.msra.mxu0 %v1124_v2  ;;  %1015 = vmatpush3.bf16.msra.mxu1 %v1130_v14  ;;  %v956_v31 = vld [vmem:[%s1816_s6] ss:$0 sm:$0xff]  ;;  %p1883_p0 = scmp.ne.s32.totalorder %s1881_s29, 0  ;;  %s1319_s30 = scalar_lea.vmem %s1318_s19, 256 }
  0xd5   : > { %996 = vmatprep.subr.bf16.mxu0 %v1401_v0  ;;  %1016 = vmatprep.subr.bf16.mxu1 %v1401_v0  ;;  %v957_v39 = vld [vmem:[%s1880_s18] ss:$0 sm:$0xff]  ;;  %p1320_p13 = scmp.lt.s32.totalorder %s1768_s23, %s1318_s19  ;;  %p1321_p7 = scmp.lt.s32.totalorder %s1319_s30, %s1313_s13 }
  0xd6   : > { %s1766_s17 = scalar_lea.hbm %s1882_s20, %s967_s16  ;;  %p1315_p4 = pnand %p1314_p10, %p1883_p0 }
  0xd7   : > { %993 = vmatmul.mubr.msk.bf16.vlgmr.msra.gmra.mrb[0].mxu0 %vm488_vm1, %v471_v4  ;;  %p1322_p3 = por %p1321_p7, %p1320_p13 }
  0xd8   : > { %997 = vmatpush3.bf16.msra.mxu0 %v1125_v5  ;;  %1000 = vmatprep.mubr.msk.bf16.mxu0 %vm1402_vm0, %v1401_v0  ;;  %p1316_p9 = pneg %p1315_p4 }
  0xd9   : > { %998 = vmatprep.subr.bf16.mxu0 %v1401_v0  ;;  %1017 = vmatpush3.bf16.msra.mxu1 %v1131_v15 }
  0xda   : > { %1018 = vmatprep.subr.bf16.mxu1 %v1401_v0  ;;  %p1323_p5 = pnand %p1322_p3, %p1316_p9 }
  0xdc   : > { %999 = vmatpush3.bf16.msra.mxu0 %v1126_v6 }
  0xdd   : > { %1004 = vmatprep.subr.bf16.mxu0 %v1401_v0  ;;  %1019 = vmatpush3.bf16.msra.mxu1 %v1132_v16 }
  0xde   : > { %1020 = vmatprep.subr.bf16.mxu1 %v1401_v0 }
  0xdf   : > { %1001 = vmatmul.mubr.msk.bf16.vlgmr.msra.gmra.mrb[4].mxu0 %vm488_vm1, %v465_v8 }
  0xe0   : > { %1005 = vmatpush3.bf16.msra.mxu0 %v1127_v9  ;;  %1008 = vmatprep.mubr.msk.bf16.mxu0 %vm1402_vm0, %v1401_v0 }
  0xe1   : > { %1006 = vmatprep.subr.bf16.mxu0 %v1401_v0  ;;  %1021 = vmatpush3.bf16.msra.mxu1 %v1133_v17 }
  0xe2   : > { %1022 = vmatprep.subr.bf16.mxu1 %v1401_v0 }
  0xe4   : > { %1007 = vmatpush3.bf16.msra.mxu0 %v1128_v10 }
  0xe5   : > { %1023 = vmatpush3.bf16.msra.mxu1 %v1134_v18 }
  0xe6   : > { %1024 = vmatprep.subr.bf16.mxu1 %v1401_v0 }
  0xe7   : > { %1009 = vmatmul.mubr.msk.bf16.vlgmr.msra.gmra.mrb[8].mxu0 %vm488_vm1, %v588_v12 }
  0xe9   : > { %1025 = vmatpush3.bf16.msra.mxu1 %v1135_v19 }
  0xea   : > { %1026 = vmatprep.subr.bf16.mxu1 %v1401_v0 }
  0xed   : > { %1027 = vmatpush3.bf16.msra.mxu1 %v1136_v20 }
 0x1aa   : > { %v526_v21 = vpop.f32.mrb[0].mxu0 }
 0x1ab   : > { %v994_v22 = vpop.f32.mrb[1].mxu0 }
 0x1ac   : > { %v529_v23 = vpop.f32.mrb[2].mxu0 }
 0x1ad   : > { %v995_v24 = vpop.f32.mrb[3].mxu0 }
 0x1b2   : > { %v581_v25 = vpop.f32.mrb[4].mxu0 }
 0x1b3   : > { %v582_v26 = vadd.f32 %v581_v25, %v526_v21  ;;  %v1002_v27 = vpop.f32.mrb[5].mxu0 }
 0x1b4   : > { %v584_v28 = vpop.f32.mrb[6].mxu0 }
 0x1b5   : > { %v1003_v29 = vpop.f32.mrb[7].mxu0 }
 0x1ba   : > { %v642_v30 = vpop.f32.mrb[8].mxu0 }
 0x1bb   : > { %v648_v32 = vadd.f32 %v642_v30, %v582_v26  ;;  %v1010_v33 = vpop.f32.mrb[9].mxu0 }
 0x1bc   : > { %v645_v34 = vpop.f32.mrb[10].mxu0 }
 0x1bd   : > { %v656_v35 = vadd.f32 %v956_v31, %v648_v32  ;;  %v1011_v36 = vpop.f32.mrb[11].mxu0 }
 0x1bf   : > { %v657_v37 = vpack.c.bf16 %v656_v35, %v656_v35 }
 0x1c1   : > { %1137 = vtanh.bf16 %v657_v37 }
 0x1cc   : > { %v1138_v38 = vpop.eup %1137 }
 0x1cd   : > { %1029 = vmatmul.mubr.bf16.vlgmr.msra.gmra.mrb[0].mxu1 %v1138_v38 }
 0x2a0   : > { %v764_v40 = vpop.f32.mrb[0].mxu1 }
 0x2a1   : > { %v765_v41 = vadd.f32 %v957_v39, %v764_v40  ;;  %v1030_v42 = vpop.f32.mrb[1].mxu1 }
 0x2a2   : > { %v767_v43 = vpop.f32.mrb[2].mxu1 }
 0x2a3   : > { %770 = vst [vmem:[%s462_s25] sm:$0xff] %v765_v41  ;;  %v1031_v44 = vpop.f32.mrb[3].mxu1 }
 0x2a4   : > { %1326 = shalt.err (!%p1323_p5)
}
 0x2a5   : > { %s1327_s14 = scalar_lea.hbm %s1766_s17, 128  ;;  %s1331_s22 = scalar_lea.hbm %s1882_s20, 256 }
 0x2a6   : > { %p1328_p2 = scmp.ne.s32.totalorder %s1766_s17, %s1327_s14  ;;  %p1332_p12 = scmp.lt.u32.totalorder %s1766_s17, %s1882_s20 }
 0x2a7   : > { %p1333_p1 = scmp.lt.u32.totalorder %s1331_s22, %s1327_s14  ;;  %p1335_p10 = scmp.lt.u32.totalorder %s1327_s14, %s1766_s17 }
 0x2a8   : > { %p1329_p8 = pnand %p1328_p2, %p1883_p0 }
 0x2a9   : > { %p1334_p6 = por %p1333_p1, %p1332_p12 }
 0x2aa   : > { %p1330_p11 = pneg %p1329_p8 }
 0x2ab   : > { %p1336_p4 = por %p1335_p10, %p1334_p6 }
 0x2ad   : > { %p1337_p9 = pnand %p1336_p4, %p1330_p11 }
 0x2af   : > { %1340 = shalt.err (!%p1337_p9)
}
 0x2b0   : > { %1050 = dma.vmem_to_hbm [thread:$0]  (%p1883_p0), %s1768_s23, 128, %s1766_s17, %s772_s24  }
 0x2b1 PF: > { %s1884_s28 = sld [smem:[#allocation19_spill]]  ;;  %s1885_s8 = sld [smem:[#allocation21_spill]] }
 0x2b2   : > { %s1886_s12 = sld [smem:[#allocation20_spill]] }
 0x2b7   : > { %s797_s18 = sand.u32 1, %s1884_s28   ;;  %p1887_p13 = scmp.ne.s32.totalorder %s1885_s8, 0 }
 0x2b8   : > { %p1888_p7 = scmp.ge.s32.totalorder %s1886_s12, 2  ;;  %s798_s16 = scalar_lea.sflag [#allocation4], %s797_s18 }
 0x2ba   : > { %p1073_p3 = pnand %p1888_p7, %p1887_p13 }
 0x2bc   : > { %1374 = dma.done.wait (!%p1073_p3), %s798_s16, 128  }
 0x2bd   : > { %1376 = vsyncadd (!%p1073_p3), %s798_s16, 4294967168  ;;  %s1889_s12 = sld [smem:[#allocation22_spill]]  ;;  %s1890_s25 = sld [smem:[#allocation23_spill]] }
 0x2be   : > { %s1891_s30 = smov %s1383_s10  ;;  %s1892_s10 = smov %s1387_s11 }
 0x2c3   : > { %p27_p5 = scmp.ge.s32.totalorder %s1889_s12, 4   ;;  %s1893_s11 = smov %s1890_s25 }
 0x2c5   :  { %29 = sbr.rel (!%p27_p5) target bundleno = 14 (0xe), region = 137 }
 0x2cc   :  { %803 = vsyncpa [#allocation3], 1 }
 0x2cd   :  { %805 = vsyncpa [#allocation3 + $0x1], 1 }
 0x2ce   :  { %806 = vsyncpa [#allocation6], 1 }
 0x2cf   :  { %808 = vsyncpa [#allocation6 + $0x1], 1 }
 0x2d0   :  { %809 = vsyncpa [#allocation9], 1 }
 0x2d1   :  { %810 = vsyncpa [#allocation12], 1 }
 0x2d2   :  { %811 = vsyncpa [#allocation4], 1 }
 0x2d3   :  { %813 = vsyncpa [#allocation4 + $0x1], 1 }

</bundles_post_ra>
